<compile_context>
chip_gen: v7x
topology: tpu7x:2x2x1
jax: 0.10.0
libtpu: 0.0.40
codegen_flags: <defaults>
</compile_context>

<pallas_src>
import math

import jax
import jax.numpy as jnp
from jax import lax
from jax.experimental import pallas as pl
from jax.experimental.pallas import tpu as pltpu


# ------------------------------ small helpers --------------------------------

def _sigmoid(x):
    # exp on EUP + approximate reciprocal on EUP (no VPU divide).
    return pl.reciprocal(1.0 + jnp.exp(-x), approx=True)


def _silu(x):
    return x * _sigmoid(x)


def _softplus(x):
    # numerically stable; the log argument is in [1, 2].
    return jnp.maximum(x, 0.0) + jnp.log(1.0 + jnp.exp(-jnp.abs(x)))


def _pick_chunk(L, max_chunk=128):
    """Largest divisor of L that is <= max_chunk, preferring multiples of 8."""
    best = None
    for c in range(min(L, max_chunk), 0, -1):
        if L % c == 0:
            if c % 8 == 0:
                return c
            if best is None:
                best = c
    return best if best is not None else L


# ----------------------------- fused block kernel ----------------------------

def _make_block_kernel(has_residual: bool, eps: float, K: int, conv_pad: int,
                       chunk: int, d_state: int):
    """Grid = (batch, L-chunk). State (scan h, conv tail) carried in VMEM scratch."""
    base = conv_pad - (K - 1)
    total = conv_pad + chunk
    use_roll = (K > 1) and (total % 8 == 0) and (base >= 0)
    n_full = chunk // 8
    rem = chunk - n_full * 8
    bf16 = jnp.bfloat16
    f32 = jnp.float32

    def kernel(*refs):
        idx = 0
        h_ref = refs[idx]; idx += 1
        r_ref = None
        if has_residual:
            r_ref = refs[idx]; idx += 1
        (ln_w_ref, ln_b_ref, wxz_ref, cw_ref, cb_ref, xproj_ref, dtup_ref,
         dtb_ref, at_ref, dsk_ref, wo_ref,
         out_ref, res_ref,
         xpad_ref, dts_ref, dtu_ref, bmat_ref, cmat_ref, ys_ref, hst_ref) = refs[idx:]

        c = pl.program_id(1)                      # L-chunk index ("arbitrary" axis)

        # ---------- fused residual add + LayerNorm (population variance) ----------
        x = h_ref[0].astype(f32)                                  # (chunk, D)
        if has_residual:
            x = x + r_ref[0].astype(f32)
        res_ref[0] = x.astype(res_ref.dtype)
        mean = jnp.mean(x, axis=-1, keepdims=True)
        xc = x - mean
        var = jnp.mean(xc * xc, axis=-1, keepdims=True)
        normed = xc * lax.rsqrt(var + eps) * ln_w_ref[...] + ln_b_ref[...]

        # ---------- fused in-projection: one MXU pass for x-branch and gate ----------
        xz = jnp.dot(normed.astype(bf16), wxz_ref[...], preferred_element_type=f32)
        d_inner = xz.shape[-1] // 2
        x_in = xz[:, :d_inner]                                    # (chunk, dI)
        z = xz[:, d_inner:]                                       # (chunk, dI)

        # ---------- causal depthwise conv (tail carried across chunks) ----------
        if K > 1:
            @pl.when(c == 0)
            def _():
                xpad_ref[0:conv_pad, :] = jnp.zeros((conv_pad, d_inner), f32)

            @pl.when(c > 0)
            def _():   # carry last K-1 conv-input rows of the previous chunk
                xpad_ref[conv_pad - (K - 1):conv_pad, :] = (
                    xpad_ref[conv_pad + chunk - (K - 1):conv_pad + chunk, :])
        xpad_ref[conv_pad:conv_pad + chunk, :] = x_in             # aligned store

        padded = xpad_ref[...]                                    # one aligned load
        acc = jnp.broadcast_to(cb_ref[...], (chunk, d_inner))     # conv bias (hoisted)
        for k in range(K):                                        # K tiny & static
            start = base + k
            if use_roll:
                shift = (total - start) % total
                tap = pltpu.roll(padded, shift=shift, axis=0) if shift else padded
                tap = tap[0:chunk, :]                             # aligned slice
            else:
                tap = padded[start:start + chunk, :]
            acc = acc + tap * cw_ref[k, :][None, :]
        x_conv = _silu(acc)                                       # (chunk, dI)

        # ---------- fused x_proj (dt_low | B | C) + small dt up-projection ----------
        xdbl = jnp.dot(x_conv.astype(bf16), xproj_ref[...],
                       preferred_element_type=f32)                # (chunk, R + 2*dS)
        R = dtup_ref.shape[0]
        dt_low = xdbl[:, :R]
        bmat_ref[...] = xdbl[:, R:R + d_state]
        cmat_ref[...] = xdbl[:, R + d_state:R + 2 * d_state]
        dt_pre = jnp.dot(dt_low.astype(bf16), dtup_ref[...],
                         preferred_element_type=f32) + dtb_ref[...]
        dt = _softplus(dt_pre)                                    # hoisted out of scan
        dts_ref[...] = dt
        dtu_ref[...] = dt * x_conv

        # ---------- selective scan: 8-step blocks, state carried across chunks ----------
        @pl.when(c == 0)
        def _():
            hst_ref[...] = jnp.zeros_like(hst_ref)

        a_t = at_ref[...]                                         # (dS, dI) = (-exp(A_log)).T
        h = hst_ref[...]

        def blk_body(blk, h):
            t0 = pl.multiple_of(blk * 8, 8)
            dt_blk = dts_ref[pl.ds(t0, 8), :]                     # aligned (8, dI) loads
            dtu_blk = dtu_ref[pl.ds(t0, 8), :]
            b_blk = bmat_ref[pl.ds(t0, 8), :]                     # (8, dS)
            c_blk = cmat_ref[pl.ds(t0, 8), :]                     # (8, dS)
            # Hoisted off the h-recurrence: exp (EUP) and the lane->sublane
            # broadcasts of B/C rows only depend on the block loads.
            dA = [jnp.exp(dt_blk[s:s + 1, :] * a_t) for s in range(8)]          # (dS, dI)
            dBu = [dtu_blk[s:s + 1, :] * b_blk[s][:, None] for s in range(8)]   # (dS, dI)
            c_cols = [c_blk[s][:, None] for s in range(8)]                      # (dS, 1)
            y_rows = []
            for s in range(8):
                h = dA[s] * h + dBu[s]                            # only VPU mul+add on chain
                y_rows.append(jnp.sum(h * c_cols[s], axis=0, keepdims=True))
            ys_ref[pl.ds(t0, 8), :] = jnp.concatenate(y_rows, axis=0)   # one (8, dI) store
            return h

        if n_full > 0:
            h = lax.fori_loop(0, n_full, blk_body, h)
        if rem > 0:                                               # only if chunk % 8 != 0
            def row_body(t, h):
                dt_row = dts_ref[pl.ds(t, 1), :]
                dtu_row = dtu_ref[pl.ds(t, 1), :]
                b_col = bmat_ref[t][:, None]
                c_col = cmat_ref[t][:, None]
                h = jnp.exp(dt_row * a_t) * h + dtu_row * b_col
                ys_ref[pl.ds(t, 1), :] = jnp.sum(h * c_col, axis=0, keepdims=True)
                return h
            h = lax.fori_loop(n_full * 8, chunk, row_body, h, unroll=True)
        hst_ref[...] = h                                          # carry to next chunk

        # ---------- D skip, SiLU(z) gate, output projection ----------
        y = (ys_ref[...] + dsk_ref[...] * x_conv) * _silu(z)
        out = jnp.dot(y.astype(bf16), wo_ref[...], preferred_element_type=f32)
        out_ref[0] = out.astype(out_ref.dtype)

    return kernel


# ------------------------------- block forward --------------------------------

def mamba_block_forward(params, hidden_states, residual=None, eps=1e-5, max_chunk=128):
    """Returns (mixer_output, residual_out). Single fused pallas_call, grid (B, L/chunk)."""
    f32 = jnp.float32
    bf16 = jnp.bfloat16
    B, L, D = hidden_states.shape
    io_dtype = hidden_states.dtype

    in_proj_w = params["in_proj_w"].astype(f32)                   # (2*dI, D)
    d_inner = in_proj_w.shape[0] // 2
    dt_rank = params["dt_proj_w"].shape[1]
    d_state = params["A_log"].shape[1]
    K = int(params["conv_w"].shape[1])

    # ---- trace-time weight prep: bf16 for MXU operands, f32 for VPU-side params ----
    wxz = in_proj_w.T.astype(bf16)                                # (D, 2*dI): [x | z] cols
    cw = params["conv_w"].astype(f32).T                           # (K, dI) depthwise taps
    cb = params["conv_b"].astype(f32).reshape(1, d_inner)
    xproj = params["x_proj_w"].astype(f32).T.astype(bf16)         # (dI, R+2*dS): [dt_low|B|C]
    dtup = params["dt_proj_w"].astype(f32).T.astype(bf16)         # (R, dI) low-rank up-proj
    dtb = params["dt_proj_b"].astype(f32).reshape(1, d_inner)
    a_t = (-jnp.exp(params["A_log"].astype(f32))).T               # (dS, dI): dI on lanes
    dsk = params["D"].astype(f32).reshape(1, d_inner)
    wo = params["out_proj_w"].astype(f32).T.astype(bf16)          # (dI, D)
    ln_w = params["ln_w"].astype(f32).reshape(1, D)
    ln_b = params["ln_b"].astype(f32).reshape(1, D)

    has_residual = residual is not None
    conv_pad = 0 if K <= 1 else ((K - 1 + 7) // 8) * 8            # 8-row aligned pad/tail
    chunk = _pick_chunk(L, max_chunk)
    n_chunks = L // chunk
    if n_chunks > 1:
        assert chunk >= K - 1, "chunk must cover the conv receptive-field tail"

    io_spec = pl.BlockSpec((1, chunk, D), lambda b, c: (b, c, 0))
    inputs = [hidden_states]
    in_specs = [io_spec]
    if has_residual:
        inputs.append(residual)
        in_specs.append(io_spec)
    weights = [ln_w, ln_b, wxz, cw, cb, xproj, dtup, dtb, a_t, dsk, wo]
    inputs += weights
    in_specs += [pl.BlockSpec(w.shape, lambda b, c: (0, 0)) for w in weights]

    kernel = _make_block_kernel(has_residual, float(eps), K, conv_pad, chunk, d_state)

    scratch_shapes = [
        pltpu.VMEM((conv_pad + chunk, d_inner), f32),             # padded conv input + tail
        pltpu.VMEM((chunk, d_inner), f32),                        # softplus(dt)
        pltpu.VMEM((chunk, d_inner), f32),                        # dt * u
        pltpu.VMEM((chunk, d_state), f32),                        # B rows
        pltpu.VMEM((chunk, d_state), f32),                        # C rows
        pltpu.VMEM((chunk, d_inner), f32),                        # scan output (pre-gate)
        pltpu.VMEM((d_state, d_inner), f32),                      # carried SSM state h
    ]

    # ---- cost estimate + VMEM budget (review: explicit vmem_limit + CostEstimate) ----
    tokens = B * L
    matmul_flops = 2 * tokens * (D * 2 * d_inner
                                 + d_inner * (dt_rank + 2 * d_state)
                                 + dt_rank * d_inner
                                 + d_inner * D)
    scan_flops = tokens * (6 * d_state * d_inner + 10 * d_inner)
    conv_flops = tokens * 2 * K * d_inner
    flops = int(matmul_flops + scan_flops + conv_flops)
    transcendentals = int(tokens * (d_state * d_inner + 5 * d_inner))
    itemsize = jnp.dtype(io_dtype).itemsize
    weight_bytes = int(sum(int(w.size) * jnp.dtype(w.dtype).itemsize for w in weights))
    io_streams = (2 if has_residual else 1) + 2
    bytes_accessed = int(io_streams * tokens * D * itemsize + weight_bytes)

    scratch_bytes = 4 * ((conv_pad + chunk) * d_inner + 3 * chunk * d_inner
                         + 2 * chunk * d_state + d_state * d_inner)
    io_block_bytes = 2 * io_streams * chunk * D * itemsize        # double-buffered blocks
    needed = scratch_bytes + io_block_bytes + 2 * weight_bytes
    vmem_limit = int(min(max(2 * needed, 32 * 1024 * 1024), 96 * 1024 * 1024))

    out, res = pl.pallas_call(
        kernel,
        out_shape=(jax.ShapeDtypeStruct((B, L, D), io_dtype),
                   jax.ShapeDtypeStruct((B, L, D), io_dtype)),
        grid=(B, n_chunks),
        in_specs=in_specs,
        out_specs=(io_spec, io_spec),
        scratch_shapes=scratch_shapes,
        compiler_params=pltpu.CompilerParams(
            dimension_semantics=("parallel", "arbitrary"),        # batch parallel (v7x 2 TCs)
            vmem_limit_bytes=vmem_limit),
        cost_estimate=pl.CostEstimate(flops=flops,
                                      transcendentals=transcendentals,
                                      bytes_accessed=bytes_accessed),
    )(*inputs)
    return out, res


# --------------------------------- params / main -------------------------------

def init_params(key, d_model=32, expand=2, d_state=16, d_conv=4):
    d_inner = expand * d_model
    dt_rank = math.ceil(d_model / 16)
    ks = jax.random.split(key, 8)
    params = {
        "ln_w": jnp.ones((d_model,), jnp.float32),
        "ln_b": jnp.zeros((d_model,), jnp.float32),
        "in_proj_w": 0.02 * jax.random.normal(ks[0], (2 * d_inner, d_model), jnp.float32),
        "conv_w": 0.1 * jax.random.normal(ks[1], (d_inner, d_conv), jnp.float32),
        "conv_b": 0.01 * jax.random.normal(ks[2], (d_inner,), jnp.float32),
        "x_proj_w": 0.02 * jax.random.normal(ks[3], (dt_rank + 2 * d_state, d_inner), jnp.float32),
        "dt_proj_w": 0.1 * jax.random.normal(ks[4], (d_inner, dt_rank), jnp.float32),
        "dt_proj_b": 0.1 * jax.random.normal(ks[5], (d_inner,), jnp.float32),
        "A_log": jnp.log(jnp.broadcast_to(jnp.arange(1, d_state + 1, dtype=jnp.float32),
                                          (d_inner, d_state))),
        "D": jnp.ones((d_inner,), jnp.float32),
        "out_proj_w": 0.02 * jax.random.normal(ks[6], (d_model, d_inner), jnp.float32),
    }
    return params


if __name__ == "__main__":
    B, L, d_model = 2, 8, 32
    key = jax.random.PRNGKey(0)
    kp, kh, kr = jax.random.split(key, 3)
    params = init_params(kp, d_model=d_model)

    hidden_states = jax.random.normal(kh, (B, L, d_model), jnp.float32)
    residual = jax.random.normal(kr, (B, L, d_model), jnp.float32)

    fwd = jax.jit(mamba_block_forward)
    out, res = fwd(params, hidden_states, residual)
    jax.block_until_ready((out, res))

    assert out.shape == (B, L, d_model) and res.shape == (B, L, d_model)
    assert bool(jnp.all(jnp.isfinite(out))) and bool(jnp.all(jnp.isfinite(res)))
    print("KERNEL_OK")
</pallas_src>

<mosaic_0001>
module attributes {stable_mosaic.version = 11 : i64} {
  func.func @kernel(%arg0: i32, %arg1: i32, %arg2: memref<1x8x32xf32, #tpu.memory_space<vmem>>, %arg3: memref<1x8x32xf32, #tpu.memory_space<vmem>>, %arg4: memref<1x32xf32, #tpu.memory_space<vmem>>, %arg5: memref<1x32xf32, #tpu.memory_space<vmem>>, %arg6: memref<32x128xbf16, #tpu.memory_space<vmem>>, %arg7: memref<4x64xf32, #tpu.memory_space<vmem>>, %arg8: memref<1x64xf32, #tpu.memory_space<vmem>>, %arg9: memref<64x34xbf16, #tpu.memory_space<vmem>>, %arg10: memref<2x64xbf16, #tpu.memory_space<vmem>>, %arg11: memref<1x64xf32, #tpu.memory_space<vmem>>, %arg12: memref<16x64xf32, #tpu.memory_space<vmem>>, %arg13: memref<1x64xf32, #tpu.memory_space<vmem>>, %arg14: memref<64x32xbf16, #tpu.memory_space<vmem>>, %arg15: memref<1x8x32xf32, #tpu.memory_space<vmem>>, %arg16: memref<1x8x32xf32, #tpu.memory_space<vmem>>, %arg17: memref<16x64xf32, #tpu.memory_space<vmem>>, %arg18: memref<8x64xf32, #tpu.memory_space<vmem>>, %arg19: memref<8x64xf32, #tpu.memory_space<vmem>>, %arg20: memref<8x16xf32, #tpu.memory_space<vmem>>, %arg21: memref<8x16xf32, #tpu.memory_space<vmem>>, %arg22: memref<8x64xf32, #tpu.memory_space<vmem>>, %arg23: memref<16x64xf32, #tpu.memory_space<vmem>>) attributes {dimension_semantics = [#tpu.dimension_semantics<parallel>, #tpu.dimension_semantics<arbitrary>], iteration_bounds = array<i64: 2, 1>, scalar_prefetch = 0 : i64, scratch_operands = 7 : i64, tpu.core_type = #tpu.core_type<tc>, window_params = [{transform_indices = @transform_0, window_bounds = array<i64: 1, 8, 32>}, {transform_indices = @transform_1, window_bounds = array<i64: 1, 8, 32>}, {pipeline_mode = #tpu.pipeline_mode<synchronous>, transform_indices = @transform_2, window_bounds = array<i64: 1, 32>}, {pipeline_mode = #tpu.pipeline_mode<synchronous>, transform_indices = @transform_3, window_bounds = array<i64: 1, 32>}, {pipeline_mode = #tpu.pipeline_mode<synchronous>, transform_indices = @transform_4, window_bounds = array<i64: 32, 128>}, {pipeline_mode = #tpu.pipeline_mode<synchronous>, transform_indices = @transform_5, window_bounds = array<i64: 4, 64>}, {pipeline_mode = #tpu.pipeline_mode<synchronous>, transform_indices = @transform_6, window_bounds = array<i64: 1, 64>}, {pipeline_mode = #tpu.pipeline_mode<synchronous>, transform_indices = @transform_7, window_bounds = array<i64: 64, 34>}, {pipeline_mode = #tpu.pipeline_mode<synchronous>, transform_indices = @transform_8, window_bounds = array<i64: 2, 64>}, {pipeline_mode = #tpu.pipeline_mode<synchronous>, transform_indices = @transform_9, window_bounds = array<i64: 1, 64>}, {pipeline_mode = #tpu.pipeline_mode<synchronous>, transform_indices = @transform_10, window_bounds = array<i64: 16, 64>}, {pipeline_mode = #tpu.pipeline_mode<synchronous>, transform_indices = @transform_11, window_bounds = array<i64: 1, 64>}, {pipeline_mode = #tpu.pipeline_mode<synchronous>, transform_indices = @transform_12, window_bounds = array<i64: 64, 32>}, {transform_indices = @transform_13, window_bounds = array<i64: 1, 8, 32>}, {transform_indices = @transform_14, window_bounds = array<i64: 1, 8, 32>}]} {
    %c0 = arith.constant 0 : index
    %c0_0 = arith.constant 0 : index
    %c0_1 = arith.constant 0 : index
    %0 = vector.load %arg2[%c0, %c0_0, %c0_1] : memref<1x8x32xf32, #tpu.memory_space<vmem>>, vector<1x8x32xf32>
    %1 = vector.shape_cast %0 : vector<1x8x32xf32> to vector<8x32xf32>
    %c0_2 = arith.constant 0 : index
    %c0_3 = arith.constant 0 : index
    %c0_4 = arith.constant 0 : index
    %2 = vector.load %arg3[%c0_2, %c0_3, %c0_4] : memref<1x8x32xf32, #tpu.memory_space<vmem>>, vector<1x8x32xf32>
    %3 = vector.shape_cast %2 : vector<1x8x32xf32> to vector<8x32xf32>
    %4 = arith.addf %1, %3 : vector<8x32xf32>
    %c0_5 = arith.constant 0 : index
    %c0_6 = arith.constant 0 : index
    %c0_7 = arith.constant 0 : index
    %5 = vector.load %arg16[%c0_5, %c0_6, %c0_7] : memref<1x8x32xf32, #tpu.memory_space<vmem>>, vector<1x8x32xf32>
    %6 = vector.shape_cast %5 : vector<1x8x32xf32> to vector<8x32xf32>
    %7 = vector.shape_cast %4 : vector<8x32xf32> to vector<1x8x32xf32>
    tpu.vector_store %arg16[%c0_5, %c0_6, %c0_7], %7 {strides = array<i32>} : memref<1x8x32xf32, #tpu.memory_space<vmem>>, vector<1x8x32xf32>,
    %cst = arith.constant dense<0.000000e+00> : vector<8xf32>
    %8 = vector.multi_reduction <add>, %4, %cst [1] : vector<8x32xf32> to vector<8xf32>
    %9 = vector.shape_cast %8 : vector<8xf32> to vector<8x1xf32>
    %cst_8 = arith.constant 3.200000e+01 : f32
    %10 = vector.broadcast %cst_8 : f32 to vector<8x1xf32>
    %11 = arith.divf %9, %10 : vector<8x1xf32>
    %12 = vector.broadcast %11 : vector<8x1xf32> to vector<8x32xf32>
    %13 = arith.subf %4, %12 : vector<8x32xf32>
    %14 = arith.mulf %13, %13 : vector<8x32xf32>
    %cst_9 = arith.constant dense<0.000000e+00> : vector<8xf32>
    %15 = vector.multi_reduction <add>, %14, %cst_9 [1] : vector<8x32xf32> to vector<8xf32>
    %16 = vector.shape_cast %15 : vector<8xf32> to vector<8x1xf32>
    %cst_10 = arith.constant 3.200000e+01 : f32
    %17 = vector.broadcast %cst_10 : f32 to vector<8x1xf32>
    %18 = arith.divf %16, %17 : vector<8x1xf32>
    %cst_11 = arith.constant 9.99999974E-6 : f32
    %19 = vector.broadcast %cst_11 : f32 to vector<8x1xf32>
    %20 = arith.addf %18, %19 : vector<8x1xf32>
    %21 = math.rsqrt %20 : vector<8x1xf32>
    %22 = vector.broadcast %21 : vector<8x1xf32> to vector<8x32xf32>
    %23 = arith.mulf %13, %22 : vector<8x32xf32>
    %c0_12 = arith.constant 0 : index
    %c0_13 = arith.constant 0 : index
    %24 = vector.load %arg4[%c0_12, %c0_13] : memref<1x32xf32, #tpu.memory_space<vmem>>, vector<1x32xf32>
    %25 = vector.broadcast %24 : vector<1x32xf32> to vector<8x32xf32>
    %26 = arith.mulf %23, %25 : vector<8x32xf32>
    %c0_14 = arith.constant 0 : index
    %c0_15 = arith.constant 0 : index
    %27 = vector.load %arg5[%c0_14, %c0_15] : memref<1x32xf32, #tpu.memory_space<vmem>>, vector<1x32xf32>
    %28 = vector.broadcast %27 : vector<1x32xf32> to vector<8x32xf32>
    %29 = arith.addf %26, %28 : vector<8x32xf32>
    %30 = arith.truncf %29 : vector<8x32xf32> to vector<8x32xbf16>
    %c0_16 = arith.constant 0 : index
    %c0_17 = arith.constant 0 : index
    %31 = vector.load %arg6[%c0_16, %c0_17] : memref<32x128xbf16, #tpu.memory_space<vmem>>, vector<32x128xbf16>
    %cst_18 = arith.constant dense<0.000000e+00> : vector<8x128xf32>
    %32 = tpu.matmul %30, %31, %cst_18 {dimension_numbers = #tpu.dot_dimension_numbers<[1], [0], [0], [1], [0, 0, 1, 1], [], []>} : vector<8x32xbf16>, vector<32x128xbf16>, vector<8x128xf32> -> vector<8x128xf32>
    %33 = vector.extract_strided_slice %32 {offsets = [0, 0], sizes = [8, 64], strides = [1, 1]} : vector<8x128xf32> to vector<8x64xf32>
    %34 = vector.extract_strided_slice %32 {offsets = [0, 64], sizes = [8, 64], strides = [1, 1]} : vector<8x128xf32> to vector<8x64xf32>
    %c0_i32 = arith.constant 0 : i32
    %35 = arith.cmpi eq, %arg1, %c0_i32 : i32
    %36 = arith.extui %35 : i1 to i32
    %c0_i32_19 = arith.constant 0 : i32
    %37 = arith.cmpi ne, %36, %c0_i32_19 : i32
    scf.if %37 {
      %cst_88 = arith.constant 0.000000e+00 : f32
      %310 = vector.broadcast %cst_88 : f32 to vector<8x64xf32>
      %c0_89 = arith.constant 0 : index
      %c0_90 = arith.constant 0 : index
      %311 = vector.load %arg17[%c0_89, %c0_90] : memref<16x64xf32, #tpu.memory_space<vmem>>, vector<8x64xf32>
      tpu.vector_store %arg17[%c0_89, %c0_90], %310 {strides = array<i32>} : memref<16x64xf32, #tpu.memory_space<vmem>>, vector<8x64xf32>,
    } else {
    }
    %c0_i32_20 = arith.constant 0 : i32
    %38 = arith.cmpi sgt, %arg1, %c0_i32_20 : i32
    %39 = arith.extui %38 : i1 to i32
    %c0_i32_21 = arith.constant 0 : i32
    %40 = arith.cmpi ne, %39, %c0_i32_21 : i32
    scf.if %40 {
      %c13 = arith.constant 13 : index
      %c0_88 = arith.constant 0 : index
      %310 = vector.load %arg17[%c13, %c0_88] : memref<16x64xf32, #tpu.memory_space<vmem>>, vector<3x64xf32>
      %c5 = arith.constant 5 : index
      %c0_89 = arith.constant 0 : index
      %311 = vector.load %arg17[%c5, %c0_89] : memref<16x64xf32, #tpu.memory_space<vmem>>, vector<3x64xf32>
      tpu.vector_store %arg17[%c5, %c0_89], %310 {strides = array<i32>} : memref<16x64xf32, #tpu.memory_space<vmem>>, vector<3x64xf32>,
    } else {
    }
    %c8 = arith.constant 8 : index
    %c0_22 = arith.constant 0 : index
    %41 = vector.load %arg17[%c8, %c0_22] : memref<16x64xf32, #tpu.memory_space<vmem>>, vector<8x64xf32>
    tpu.vector_store %arg17[%c8, %c0_22], %33 {strides = array<i32>} : memref<16x64xf32, #tpu.memory_space<vmem>>, vector<8x64xf32>,
    %c0_23 = arith.constant 0 : index
    %c0_24 = arith.constant 0 : index
    %42 = vector.load %arg17[%c0_23, %c0_24] : memref<16x64xf32, #tpu.memory_space<vmem>>, vector<16x64xf32>
    %c0_25 = arith.constant 0 : index
    %c0_26 = arith.constant 0 : index
    %43 = vector.load %arg8[%c0_25, %c0_26] : memref<1x64xf32, #tpu.memory_space<vmem>>, vector<1x64xf32>
    %44 = vector.shape_cast %43 : vector<1x64xf32> to vector<1x64xf32>
    %45 = vector.broadcast %44 : vector<1x64xf32> to vector<8x64xf32>
    %c11_i32 = arith.constant 11 : i32
    %46 = tpu.dynamic_rotate %42 by %c11_i32 dim 0 : vector<16x64xf32>, i32 -> vector<16x64xf32>
    %47 = vector.extract_strided_slice %46 {offsets = [0, 0], sizes = [8, 64], strides = [1, 1]} : vector<16x64xf32> to vector<8x64xf32>
    %c0_27 = arith.constant 0 : index
    %c0_28 = arith.constant 0 : index
    %48 = vector.load %arg7[%c0_27, %c0_28] : memref<4x64xf32, #tpu.memory_space<vmem>>, vector<1x64xf32>
    %49 = vector.shape_cast %48 : vector<1x64xf32> to vector<64xf32>
    %50 = vector.shape_cast %49 : vector<64xf32> to vector<1x64xf32>
    %51 = vector.broadcast %50 : vector<1x64xf32> to vector<8x64xf32>
    %52 = arith.mulf %47, %51 : vector<8x64xf32>
    %53 = arith.addf %45, %52 : vector<8x64xf32>
    %c10_i32 = arith.constant 10 : i32
    %54 = tpu.dynamic_rotate %42 by %c10_i32 dim 0 : vector<16x64xf32>, i32 -> vector<16x64xf32>
    %55 = vector.extract_strided_slice %54 {offsets = [0, 0], sizes = [8, 64], strides = [1, 1]} : vector<16x64xf32> to vector<8x64xf32>
    %c1 = arith.constant 1 : index
    %c0_29 = arith.constant 0 : index
    %56 = vector.load %arg7[%c1, %c0_29] : memref<4x64xf32, #tpu.memory_space<vmem>>, vector<1x64xf32>
    %57 = vector.shape_cast %56 : vector<1x64xf32> to vector<64xf32>
    %58 = vector.shape_cast %57 : vector<64xf32> to vector<1x64xf32>
    %59 = vector.broadcast %58 : vector<1x64xf32> to vector<8x64xf32>
    %60 = arith.mulf %55, %59 : vector<8x64xf32>
    %61 = arith.addf %53, %60 : vector<8x64xf32>
    %c9_i32 = arith.constant 9 : i32
    %62 = tpu.dynamic_rotate %42 by %c9_i32 dim 0 : vector<16x64xf32>, i32 -> vector<16x64xf32>
    %63 = vector.extract_strided_slice %62 {offsets = [0, 0], sizes = [8, 64], strides = [1, 1]} : vector<16x64xf32> to vector<8x64xf32>
    %c2 = arith.constant 2 : index
    %c0_30 = arith.constant 0 : index
    %64 = vector.load %arg7[%c2, %c0_30] : memref<4x64xf32, #tpu.memory_space<vmem>>, vector<1x64xf32>
    %65 = vector.shape_cast %64 : vector<1x64xf32> to vector<64xf32>
    %66 = vector.shape_cast %65 : vector<64xf32> to vector<1x64xf32>
    %67 = vector.broadcast %66 : vector<1x64xf32> to vector<8x64xf32>
    %68 = arith.mulf %63, %67 : vector<8x64xf32>
    %69 = arith.addf %61, %68 : vector<8x64xf32>
    %c8_i32 = arith.constant 8 : i32
    %70 = tpu.dynamic_rotate %42 by %c8_i32 dim 0 : vector<16x64xf32>, i32 -> vector<16x64xf32>
    %71 = vector.extract_strided_slice %70 {offsets = [0, 0], sizes = [8, 64], strides = [1, 1]} : vector<16x64xf32> to vector<8x64xf32>
    %c3 = arith.constant 3 : index
    %c0_31 = arith.constant 0 : index
    %72 = vector.load %arg7[%c3, %c0_31] : memref<4x64xf32, #tpu.memory_space<vmem>>, vector<1x64xf32>
    %73 = vector.shape_cast %72 : vector<1x64xf32> to vector<64xf32>
    %74 = vector.shape_cast %73 : vector<64xf32> to vector<1x64xf32>
    %75 = vector.broadcast %74 : vector<1x64xf32> to vector<8x64xf32>
    %76 = arith.mulf %71, %75 : vector<8x64xf32>
    %77 = arith.addf %69, %76 : vector<8x64xf32>
    %cst_32 = arith.constant 0.000000e+00 : f32
    %78 = vector.broadcast %cst_32 : f32 to vector<8x64xf32>
    %79 = arith.subf %78, %77 : vector<8x64xf32>
    %80 = math.exp %79 : vector<8x64xf32>
    %cst_33 = arith.constant 1.000000e+00 : f32
    %81 = vector.broadcast %cst_33 : f32 to vector<8x64xf32>
    %82 = arith.addf %81, %80 : vector<8x64xf32>
    %83 = tpu.reciprocal %82 {approx = true} : vector<8x64xf32> -> vector<8x64xf32>
    %84 = arith.mulf %77, %83 : vector<8x64xf32>
    %85 = arith.truncf %84 : vector<8x64xf32> to vector<8x64xbf16>
    %c0_34 = arith.constant 0 : index
    %c0_35 = arith.constant 0 : index
    %86 = vector.load %arg9[%c0_34, %c0_35] : memref<64x34xbf16, #tpu.memory_space<vmem>>, vector<64x34xbf16>
    %cst_36 = arith.constant dense<0.000000e+00> : vector<8x34xf32>
    %87 = tpu.matmul %85, %86, %cst_36 {dimension_numbers = #tpu.dot_dimension_numbers<[1], [0], [0], [1], [0, 0, 1, 1], [], []>} : vector<8x64xbf16>, vector<64x34xbf16>, vector<8x34xf32> -> vector<8x34xf32>
    %88 = vector.extract_strided_slice %87 {offsets = [0, 0], sizes = [8, 2], strides = [1, 1]} : vector<8x34xf32> to vector<8x2xf32>
    %89 = vector.extract_strided_slice %87 {offsets = [0, 2], sizes = [8, 16], strides = [1, 1]} : vector<8x34xf32> to vector<8x16xf32>
    %c0_37 = arith.constant 0 : index
    %c0_38 = arith.constant 0 : index
    %90 = vector.load %arg20[%c0_37, %c0_38] : memref<8x16xf32, #tpu.memory_space<vmem>>, vector<8x16xf32>
    tpu.vector_store %arg20[%c0_37, %c0_38], %89 {strides = array<i32>} : memref<8x16xf32, #tpu.memory_space<vmem>>, vector<8x16xf32>,
    %91 = vector.extract_strided_slice %87 {offsets = [0, 18], sizes = [8, 16], strides = [1, 1]} : vector<8x34xf32> to vector<8x16xf32>
    %c0_39 = arith.constant 0 : index
    %c0_40 = arith.constant 0 : index
    %92 = vector.load %arg21[%c0_39, %c0_40] : memref<8x16xf32, #tpu.memory_space<vmem>>, vector<8x16xf32>
    tpu.vector_store %arg21[%c0_39, %c0_40], %91 {strides = array<i32>} : memref<8x16xf32, #tpu.memory_space<vmem>>, vector<8x16xf32>,
    %93 = arith.truncf %88 : vector<8x2xf32> to vector<8x2xbf16>
    %c0_41 = arith.constant 0 : index
    %c0_42 = arith.constant 0 : index
    %94 = vector.load %arg10[%c0_41, %c0_42] : memref<2x64xbf16, #tpu.memory_space<vmem>>, vector<2x64xbf16>
    %cst_43 = arith.constant dense<0.000000e+00> : vector<8x64xf32>
    %95 = tpu.matmul %93, %94, %cst_43 {dimension_numbers = #tpu.dot_dimension_numbers<[1], [0], [0], [1], [0, 0, 1, 1], [], []>} : vector<8x2xbf16>, vector<2x64xbf16>, vector<8x64xf32> -> vector<8x64xf32>
    %c0_44 = arith.constant 0 : index
    %c0_45 = arith.constant 0 : index
    %96 = vector.load %arg11[%c0_44, %c0_45] : memref<1x64xf32, #tpu.memory_space<vmem>>, vector<1x64xf32>
    %97 = vector.broadcast %96 : vector<1x64xf32> to vector<8x64xf32>
    %98 = arith.addf %95, %97 : vector<8x64xf32>
    %cst_46 = arith.constant 0.000000e+00 : f32
    %99 = vector.broadcast %cst_46 : f32 to vector<8x64xf32>
    %100 = arith.maximumf %98, %99 : vector<8x64xf32>
    %101 = math.absf %98 : vector<8x64xf32>
    %cst_47 = arith.constant 0.000000e+00 : f32
    %102 = vector.broadcast %cst_47 : f32 to vector<8x64xf32>
    %103 = arith.subf %102, %101 : vector<8x64xf32>
    %104 = math.exp %103 : vector<8x64xf32>
    %cst_48 = arith.constant 1.000000e+00 : f32
    %105 = vector.broadcast %cst_48 : f32 to vector<8x64xf32>
    %106 = arith.addf %105, %104 : vector<8x64xf32>
    %107 = math.log %106 : vector<8x64xf32>
    %108 = arith.addf %100, %107 : vector<8x64xf32>
    %c0_49 = arith.constant 0 : index
    %c0_50 = arith.constant 0 : index
    %109 = vector.load %arg18[%c0_49, %c0_50] : memref<8x64xf32, #tpu.memory_space<vmem>>, vector<8x64xf32>
    tpu.vector_store %arg18[%c0_49, %c0_50], %108 {strides = array<i32>} : memref<8x64xf32, #tpu.memory_space<vmem>>, vector<8x64xf32>,
    %110 = arith.mulf %108, %84 : vector<8x64xf32>
    %c0_51 = arith.constant 0 : index
    %c0_52 = arith.constant 0 : index
    %111 = vector.load %arg19[%c0_51, %c0_52] : memref<8x64xf32, #tpu.memory_space<vmem>>, vector<8x64xf32>
    tpu.vector_store %arg19[%c0_51, %c0_52], %110 {strides = array<i32>} : memref<8x64xf32, #tpu.memory_space<vmem>>, vector<8x64xf32>,
    %c0_i32_53 = arith.constant 0 : i32
    %112 = arith.cmpi eq, %arg1, %c0_i32_53 : i32
    %113 = arith.extui %112 : i1 to i32
    %c0_i32_54 = arith.constant 0 : i32
    %114 = arith.cmpi ne, %113, %c0_i32_54 : i32
    scf.if %114 {
      %cst_88 = arith.constant 0.000000e+00 : f32
      %310 = vector.broadcast %cst_88 : f32 to vector<16x64xf32>
      %c0_89 = arith.constant 0 : index
      %c0_90 = arith.constant 0 : index
      %311 = vector.load %arg23[%c0_89, %c0_90] : memref<16x64xf32, #tpu.memory_space<vmem>>, vector<16x64xf32>
      tpu.vector_store %arg23[%c0_89, %c0_90], %310 {strides = array<i32>} : memref<16x64xf32, #tpu.memory_space<vmem>>, vector<16x64xf32>,
    } else {
    }
    %c0_55 = arith.constant 0 : index
    %c0_56 = arith.constant 0 : index
    %115 = vector.load %arg12[%c0_55, %c0_56] : memref<16x64xf32, #tpu.memory_space<vmem>>, vector<16x64xf32>
    %c0_57 = arith.constant 0 : index
    %c0_58 = arith.constant 0 : index
    %116 = vector.load %arg23[%c0_57, %c0_58] : memref<16x64xf32, #tpu.memory_space<vmem>>, vector<16x64xf32>
    %c0_i32_59 = arith.constant 0 : i32
    %c8_i32_60 = arith.constant 8 : i32
    %117 = arith.muli %c0_i32_59, %c8_i32_60 : i32
    %118 = tpu.assume_multiple %117, 8 : i32
    %119 = arith.index_cast %118 : i32 to index
    %c0_61 = arith.constant 0 : index
    %120 = vector.load %arg18[%119, %c0_61] : memref<8x64xf32, #tpu.memory_space<vmem>>, vector<8x64xf32>
    %121 = arith.index_cast %118 : i32 to index
    %c0_62 = arith.constant 0 : index
    %122 = vector.load %arg19[%121, %c0_62] : memref<8x64xf32, #tpu.memory_space<vmem>>, vector<8x64xf32>
    %123 = arith.index_cast %118 : i32 to index
    %c0_63 = arith.constant 0 : index
    %124 = vector.load %arg20[%123, %c0_63] : memref<8x16xf32, #tpu.memory_space<vmem>>, vector<8x16xf32>
    %125 = arith.index_cast %118 : i32 to index
    %c0_64 = arith.constant 0 : index
    %126 = vector.load %arg21[%125, %c0_64] : memref<8x16xf32, #tpu.memory_space<vmem>>, vector<8x16xf32>
    %127 = vector.extract_strided_slice %120 {offsets = [0, 0], sizes = [1, 64], strides = [1, 1]} : vector<8x64xf32> to vector<1x64xf32>
    %128 = vector.broadcast %127 : vector<1x64xf32> to vector<16x64xf32>
    %129 = arith.mulf %128, %115 : vector<16x64xf32>
    %130 = math.exp %129 : vector<16x64xf32>
    %131 = vector.extract_strided_slice %120 {offsets = [1, 0], sizes = [1, 64], strides = [1, 1]} : vector<8x64xf32> to vector<1x64xf32>
    %132 = vector.broadcast %131 : vector<1x64xf32> to vector<16x64xf32>
    %133 = arith.mulf %132, %115 : vector<16x64xf32>
    %134 = math.exp %133 : vector<16x64xf32>
    %135 = vector.extract_strided_slice %120 {offsets = [2, 0], sizes = [1, 64], strides = [1, 1]} : vector<8x64xf32> to vector<1x64xf32>
    %136 = vector.broadcast %135 : vector<1x64xf32> to vector<16x64xf32>
    %137 = arith.mulf %136, %115 : vector<16x64xf32>
    %138 = math.exp %137 : vector<16x64xf32>
    %139 = vector.extract_strided_slice %120 {offsets = [3, 0], sizes = [1, 64], strides = [1, 1]} : vector<8x64xf32> to vector<1x64xf32>
    %140 = vector.broadcast %139 : vector<1x64xf32> to vector<16x64xf32>
    %141 = arith.mulf %140, %115 : vector<16x64xf32>
    %142 = math.exp %141 : vector<16x64xf32>
    %143 = vector.extract_strided_slice %120 {offsets = [4, 0], sizes = [1, 64], strides = [1, 1]} : vector<8x64xf32> to vector<1x64xf32>
    %144 = vector.broadcast %143 : vector<1x64xf32> to vector<16x64xf32>
    %145 = arith.mulf %144, %115 : vector<16x64xf32>
    %146 = math.exp %145 : vector<16x64xf32>
    %147 = vector.extract_strided_slice %120 {offsets = [5, 0], sizes = [1, 64], strides = [1, 1]} : vector<8x64xf32> to vector<1x64xf32>
    %148 = vector.broadcast %147 : vector<1x64xf32> to vector<16x64xf32>
    %149 = arith.mulf %148, %115 : vector<16x64xf32>
    %150 = math.exp %149 : vector<16x64xf32>
    %151 = vector.extract_strided_slice %120 {offsets = [6, 0], sizes = [1, 64], strides = [1, 1]} : vector<8x64xf32> to vector<1x64xf32>
    %152 = vector.broadcast %151 : vector<1x64xf32> to vector<16x64xf32>
    %153 = arith.mulf %152, %115 : vector<16x64xf32>
    %154 = math.exp %153 : vector<16x64xf32>
    %155 = vector.extract_strided_slice %120 {offsets = [7, 0], sizes = [1, 64], strides = [1, 1]} : vector<8x64xf32> to vector<1x64xf32>
    %156 = vector.broadcast %155 : vector<1x64xf32> to vector<16x64xf32>
    %157 = arith.mulf %156, %115 : vector<16x64xf32>
    %158 = math.exp %157 : vector<16x64xf32>
    %159 = vector.extract_strided_slice %122 {offsets = [0, 0], sizes = [1, 64], strides = [1, 1]} : vector<8x64xf32> to vector<1x64xf32>
    %160 = vector.extract_strided_slice %124 {offsets = [0, 0], sizes = [1, 16], strides = [1, 1]} : vector<8x16xf32> to vector<1x16xf32>
    %161 = vector.shape_cast %160 : vector<1x16xf32> to vector<16xf32>
    %162 = vector.shape_cast %161 : vector<16xf32> to vector<16x1xf32>
    %163 = vector.broadcast %159 : vector<1x64xf32> to vector<16x64xf32>
    %164 = vector.broadcast %162 : vector<16x1xf32> to vector<16x64xf32>
    %165 = arith.mulf %163, %164 : vector<16x64xf32>
    %166 = vector.extract_strided_slice %122 {offsets = [1, 0], sizes = [1, 64], strides = [1, 1]} : vector<8x64xf32> to vector<1x64xf32>
    %167 = vector.extract_strided_slice %124 {offsets = [1, 0], sizes = [1, 16], strides = [1, 1]} : vector<8x16xf32> to vector<1x16xf32>
    %168 = vector.shape_cast %167 : vector<1x16xf32> to vector<16xf32>
    %169 = vector.shape_cast %168 : vector<16xf32> to vector<16x1xf32>
    %170 = vector.broadcast %166 : vector<1x64xf32> to vector<16x64xf32>
    %171 = vector.broadcast %169 : vector<16x1xf32> to vector<16x64xf32>
    %172 = arith.mulf %170, %171 : vector<16x64xf32>
    %173 = vector.extract_strided_slice %122 {offsets = [2, 0], sizes = [1, 64], strides = [1, 1]} : vector<8x64xf32> to vector<1x64xf32>
    %174 = vector.extract_strided_slice %124 {offsets = [2, 0], sizes = [1, 16], strides = [1, 1]} : vector<8x16xf32> to vector<1x16xf32>
    %175 = vector.shape_cast %174 : vector<1x16xf32> to vector<16xf32>
    %176 = vector.shape_cast %175 : vector<16xf32> to vector<16x1xf32>
    %177 = vector.broadcast %173 : vector<1x64xf32> to vector<16x64xf32>
    %178 = vector.broadcast %176 : vector<16x1xf32> to vector<16x64xf32>
    %179 = arith.mulf %177, %178 : vector<16x64xf32>
    %180 = vector.extract_strided_slice %122 {offsets = [3, 0], sizes = [1, 64], strides = [1, 1]} : vector<8x64xf32> to vector<1x64xf32>
    %181 = vector.extract_strided_slice %124 {offsets = [3, 0], sizes = [1, 16], strides = [1, 1]} : vector<8x16xf32> to vector<1x16xf32>
    %182 = vector.shape_cast %181 : vector<1x16xf32> to vector<16xf32>
    %183 = vector.shape_cast %182 : vector<16xf32> to vector<16x1xf32>
    %184 = vector.broadcast %180 : vector<1x64xf32> to vector<16x64xf32>
    %185 = vector.broadcast %183 : vector<16x1xf32> to vector<16x64xf32>
    %186 = arith.mulf %184, %185 : vector<16x64xf32>
    %187 = vector.extract_strided_slice %122 {offsets = [4, 0], sizes = [1, 64], strides = [1, 1]} : vector<8x64xf32> to vector<1x64xf32>
    %188 = vector.extract_strided_slice %124 {offsets = [4, 0], sizes = [1, 16], strides = [1, 1]} : vector<8x16xf32> to vector<1x16xf32>
    %189 = vector.shape_cast %188 : vector<1x16xf32> to vector<16xf32>
    %190 = vector.shape_cast %189 : vector<16xf32> to vector<16x1xf32>
    %191 = vector.broadcast %187 : vector<1x64xf32> to vector<16x64xf32>
    %192 = vector.broadcast %190 : vector<16x1xf32> to vector<16x64xf32>
    %193 = arith.mulf %191, %192 : vector<16x64xf32>
    %194 = vector.extract_strided_slice %122 {offsets = [5, 0], sizes = [1, 64], strides = [1, 1]} : vector<8x64xf32> to vector<1x64xf32>
    %195 = vector.extract_strided_slice %124 {offsets = [5, 0], sizes = [1, 16], strides = [1, 1]} : vector<8x16xf32> to vector<1x16xf32>
    %196 = vector.shape_cast %195 : vector<1x16xf32> to vector<16xf32>
    %197 = vector.shape_cast %196 : vector<16xf32> to vector<16x1xf32>
    %198 = vector.broadcast %194 : vector<1x64xf32> to vector<16x64xf32>
    %199 = vector.broadcast %197 : vector<16x1xf32> to vector<16x64xf32>
    %200 = arith.mulf %198, %199 : vector<16x64xf32>
    %201 = vector.extract_strided_slice %122 {offsets = [6, 0], sizes = [1, 64], strides = [1, 1]} : vector<8x64xf32> to vector<1x64xf32>
    %202 = vector.extract_strided_slice %124 {offsets = [6, 0], sizes = [1, 16], strides = [1, 1]} : vector<8x16xf32> to vector<1x16xf32>
    %203 = vector.shape_cast %202 : vector<1x16xf32> to vector<16xf32>
    %204 = vector.shape_cast %203 : vector<16xf32> to vector<16x1xf32>
    %205 = vector.broadcast %201 : vector<1x64xf32> to vector<16x64xf32>
    %206 = vector.broadcast %204 : vector<16x1xf32> to vector<16x64xf32>
    %207 = arith.mulf %205, %206 : vector<16x64xf32>
    %208 = vector.extract_strided_slice %122 {offsets = [7, 0], sizes = [1, 64], strides = [1, 1]} : vector<8x64xf32> to vector<1x64xf32>
    %209 = vector.extract_strided_slice %124 {offsets = [7, 0], sizes = [1, 16], strides = [1, 1]} : vector<8x16xf32> to vector<1x16xf32>
    %210 = vector.shape_cast %209 : vector<1x16xf32> to vector<16xf32>
    %211 = vector.shape_cast %210 : vector<16xf32> to vector<16x1xf32>
    %212 = vector.broadcast %208 : vector<1x64xf32> to vector<16x64xf32>
    %213 = vector.broadcast %211 : vector<16x1xf32> to vector<16x64xf32>
    %214 = arith.mulf %212, %213 : vector<16x64xf32>
    %215 = vector.extract_strided_slice %126 {offsets = [0, 0], sizes = [1, 16], strides = [1, 1]} : vector<8x16xf32> to vector<1x16xf32>
    %216 = vector.shape_cast %215 : vector<1x16xf32> to vector<16xf32>
    %217 = vector.shape_cast %216 : vector<16xf32> to vector<16x1xf32>
    %218 = vector.extract_strided_slice %126 {offsets = [1, 0], sizes = [1, 16], strides = [1, 1]} : vector<8x16xf32> to vector<1x16xf32>
    %219 = vector.shape_cast %218 : vector<1x16xf32> to vector<16xf32>
    %220 = vector.shape_cast %219 : vector<16xf32> to vector<16x1xf32>
    %221 = vector.extract_strided_slice %126 {offsets = [2, 0], sizes = [1, 16], strides = [1, 1]} : vector<8x16xf32> to vector<1x16xf32>
    %222 = vector.shape_cast %221 : vector<1x16xf32> to vector<16xf32>
    %223 = vector.shape_cast %222 : vector<16xf32> to vector<16x1xf32>
    %224 = vector.extract_strided_slice %126 {offsets = [3, 0], sizes = [1, 16], strides = [1, 1]} : vector<8x16xf32> to vector<1x16xf32>
    %225 = vector.shape_cast %224 : vector<1x16xf32> to vector<16xf32>
    %226 = vector.shape_cast %225 : vector<16xf32> to vector<16x1xf32>
    %227 = vector.extract_strided_slice %126 {offsets = [4, 0], sizes = [1, 16], strides = [1, 1]} : vector<8x16xf32> to vector<1x16xf32>
    %228 = vector.shape_cast %227 : vector<1x16xf32> to vector<16xf32>
    %229 = vector.shape_cast %228 : vector<16xf32> to vector<16x1xf32>
    %230 = vector.extract_strided_slice %126 {offsets = [5, 0], sizes = [1, 16], strides = [1, 1]} : vector<8x16xf32> to vector<1x16xf32>
    %231 = vector.shape_cast %230 : vector<1x16xf32> to vector<16xf32>
    %232 = vector.shape_cast %231 : vector<16xf32> to vector<16x1xf32>
    %233 = vector.extract_strided_slice %126 {offsets = [6, 0], sizes = [1, 16], strides = [1, 1]} : vector<8x16xf32> to vector<1x16xf32>
    %234 = vector.shape_cast %233 : vector<1x16xf32> to vector<16xf32>
    %235 = vector.shape_cast %234 : vector<16xf32> to vector<16x1xf32>
    %236 = vector.extract_strided_slice %126 {offsets = [7, 0], sizes = [1, 16], strides = [1, 1]} : vector<8x16xf32> to vector<1x16xf32>
    %237 = vector.shape_cast %236 : vector<1x16xf32> to vector<16xf32>
    %238 = vector.shape_cast %237 : vector<16xf32> to vector<16x1xf32>
    %239 = arith.mulf %130, %116 : vector<16x64xf32>
    %240 = arith.addf %239, %165 : vector<16x64xf32>
    %241 = vector.broadcast %217 : vector<16x1xf32> to vector<16x64xf32>
    %242 = arith.mulf %240, %241 : vector<16x64xf32>
    %cst_65 = arith.constant dense<0.000000e+00> : vector<64xf32>
    %243 = vector.multi_reduction <add>, %242, %cst_65 [0] : vector<16x64xf32> to vector<64xf32>
    %244 = vector.shape_cast %243 : vector<64xf32> to vector<1x64xf32>
    %245 = arith.mulf %134, %240 : vector<16x64xf32>
    %246 = arith.addf %245, %172 : vector<16x64xf32>
    %247 = vector.broadcast %220 : vector<16x1xf32> to vector<16x64xf32>
    %248 = arith.mulf %246, %247 : vector<16x64xf32>
    %cst_66 = arith.constant dense<0.000000e+00> : vector<64xf32>
    %249 = vector.multi_reduction <add>, %248, %cst_66 [0] : vector<16x64xf32> to vector<64xf32>
    %250 = vector.shape_cast %249 : vector<64xf32> to vector<1x64xf32>
    %251 = arith.mulf %138, %246 : vector<16x64xf32>
    %252 = arith.addf %251, %179 : vector<16x64xf32>
    %253 = vector.broadcast %223 : vector<16x1xf32> to vector<16x64xf32>
    %254 = arith.mulf %252, %253 : vector<16x64xf32>
    %cst_67 = arith.constant dense<0.000000e+00> : vector<64xf32>
    %255 = vector.multi_reduction <add>, %254, %cst_67 [0] : vector<16x64xf32> to vector<64xf32>
    %256 = vector.shape_cast %255 : vector<64xf32> to vector<1x64xf32>
    %257 = arith.mulf %142, %252 : vector<16x64xf32>
    %258 = arith.addf %257, %186 : vector<16x64xf32>
    %259 = vector.broadcast %226 : vector<16x1xf32> to vector<16x64xf32>
    %260 = arith.mulf %258, %259 : vector<16x64xf32>
    %cst_68 = arith.constant dense<0.000000e+00> : vector<64xf32>
    %261 = vector.multi_reduction <add>, %260, %cst_68 [0] : vector<16x64xf32> to vector<64xf32>
    %262 = vector.shape_cast %261 : vector<64xf32> to vector<1x64xf32>
    %263 = arith.mulf %146, %258 : vector<16x64xf32>
    %264 = arith.addf %263, %193 : vector<16x64xf32>
    %265 = vector.broadcast %229 : vector<16x1xf32> to vector<16x64xf32>
    %266 = arith.mulf %264, %265 : vector<16x64xf32>
    %cst_69 = arith.constant dense<0.000000e+00> : vector<64xf32>
    %267 = vector.multi_reduction <add>, %266, %cst_69 [0] : vector<16x64xf32> to vector<64xf32>
    %268 = vector.shape_cast %267 : vector<64xf32> to vector<1x64xf32>
    %269 = arith.mulf %150, %264 : vector<16x64xf32>
    %270 = arith.addf %269, %200 : vector<16x64xf32>
    %271 = vector.broadcast %232 : vector<16x1xf32> to vector<16x64xf32>
    %272 = arith.mulf %270, %271 : vector<16x64xf32>
    %cst_70 = arith.constant dense<0.000000e+00> : vector<64xf32>
    %273 = vector.multi_reduction <add>, %272, %cst_70 [0] : vector<16x64xf32> to vector<64xf32>
    %274 = vector.shape_cast %273 : vector<64xf32> to vector<1x64xf32>
    %275 = arith.mulf %154, %270 : vector<16x64xf32>
    %276 = arith.addf %275, %207 : vector<16x64xf32>
    %277 = vector.broadcast %235 : vector<16x1xf32> to vector<16x64xf32>
    %278 = arith.mulf %276, %277 : vector<16x64xf32>
    %cst_71 = arith.constant dense<0.000000e+00> : vector<64xf32>
    %279 = vector.multi_reduction <add>, %278, %cst_71 [0] : vector<16x64xf32> to vector<64xf32>
    %280 = vector.shape_cast %279 : vector<64xf32> to vector<1x64xf32>
    %281 = arith.mulf %158, %276 : vector<16x64xf32>
    %282 = arith.addf %281, %214 : vector<16x64xf32>
    %283 = vector.broadcast %238 : vector<16x1xf32> to vector<16x64xf32>
    %284 = arith.mulf %282, %283 : vector<16x64xf32>
    %cst_72 = arith.constant dense<0.000000e+00> : vector<64xf32>
    %285 = vector.multi_reduction <add>, %284, %cst_72 [0] : vector<16x64xf32> to vector<64xf32>
    %286 = vector.shape_cast %285 : vector<64xf32> to vector<1x64xf32>
    %287 = tpu.concatenate %244, %250, %256, %262, %268, %274, %280, %286 in 0 : vector<1x64xf32>, vector<1x64xf32>, vector<1x64xf32>, vector<1x64xf32>, vector<1x64xf32>, vector<1x64xf32>, vector<1x64xf32>, vector<1x64xf32> -> vector<8x64xf32>
    %288 = arith.index_cast %118 : i32 to index
    %c0_73 = arith.constant 0 : index
    %289 = vector.load %arg22[%288, %c0_73] : memref<8x64xf32, #tpu.memory_space<vmem>>, vector<8x64xf32>
    tpu.vector_store %arg22[%288, %c0_73], %287 {strides = array<i32>} : memref<8x64xf32, #tpu.memory_space<vmem>>, vector<8x64xf32>,
    %c1_i32 = arith.constant 1 : i32
    %c0_74 = arith.constant 0 : index
    %c0_75 = arith.constant 0 : index
    %290 = vector.load %arg23[%c0_74, %c0_75] : memref<16x64xf32, #tpu.memory_space<vmem>>, vector<16x64xf32>
    tpu.vector_store %arg23[%c0_74, %c0_75], %282 {strides = array<i32>} : memref<16x64xf32, #tpu.memory_space<vmem>>, vector<16x64xf32>,
    %c0_76 = arith.constant 0 : index
    %c0_77 = arith.constant 0 : index
    %291 = vector.load %arg22[%c0_76, %c0_77] : memref<8x64xf32, #tpu.memory_space<vmem>>, vector<8x64xf32>
    %c0_78 = arith.constant 0 : index
    %c0_79 = arith.constant 0 : index
    %292 = vector.load %arg13[%c0_78, %c0_79] : memref<1x64xf32, #tpu.memory_space<vmem>>, vector<1x64xf32>
    %293 = vector.broadcast %292 : vector<1x64xf32> to vector<8x64xf32>
    %294 = arith.mulf %293, %84 : vector<8x64xf32>
    %295 = arith.addf %291, %294 : vector<8x64xf32>
    %cst_80 = arith.constant 0.000000e+00 : f32
    %296 = vector.broadcast %cst_80 : f32 to vector<8x64xf32>
    %297 = arith.subf %296, %34 : vector<8x64xf32>
    %298 = math.exp %297 : vector<8x64xf32>
    %cst_81 = arith.constant 1.000000e+00 : f32
    %299 = vector.broadcast %cst_81 : f32 to vector<8x64xf32>
    %300 = arith.addf %299, %298 : vector<8x64xf32>
    %301 = tpu.reciprocal %300 {approx = true} : vector<8x64xf32> -> vector<8x64xf32>
    %302 = arith.mulf %34, %301 : vector<8x64xf32>
    %303 = arith.mulf %295, %302 : vector<8x64xf32>
    %304 = arith.truncf %303 : vector<8x64xf32> to vector<8x64xbf16>
    %c0_82 = arith.constant 0 : index
    %c0_83 = arith.constant 0 : index
    %305 = vector.load %arg14[%c0_82, %c0_83] : memref<64x32xbf16, #tpu.memory_space<vmem>>, vector<64x32xbf16>
    %cst_84 = arith.constant dense<0.000000e+00> : vector<8x32xf32>
    %306 = tpu.matmul %304, %305, %cst_84 {dimension_numbers = #tpu.dot_dimension_numbers<[1], [0], [0], [1], [0, 0, 1, 1], [], []>} : vector<8x64xbf16>, vector<64x32xbf16>, vector<8x32xf32> -> vector<8x32xf32>
    %c0_85 = arith.constant 0 : index
    %c0_86 = arith.constant 0 : index
    %c0_87 = arith.constant 0 : index
    %307 = vector.load %arg15[%c0_85, %c0_86, %c0_87] : memref<1x8x32xf32, #tpu.memory_space<vmem>>, vector<1x8x32xf32>
    %308 = vector.shape_cast %307 : vector<1x8x32xf32> to vector<8x32xf32>
    %309 = vector.shape_cast %306 : vector<8x32xf32> to vector<1x8x32xf32>
    tpu.vector_store %arg15[%c0_85, %c0_86, %c0_87], %309 {strides = array<i32>} : memref<1x8x32xf32, #tpu.memory_space<vmem>>, vector<1x8x32xf32>,
    return
  }
  func.func @transform_0(%arg0: i32, %arg1: i32) -> (i32, i32, i32) {
    %c0_i32 = arith.constant 0 : i32
    %c0_i32_0 = arith.constant 0 : i32
    return %arg0, %arg1, %c0_i32 : i32, i32, i32
  }
  func.func @transform_1(%arg0: i32, %arg1: i32) -> (i32, i32, i32) {
    %c0_i32 = arith.constant 0 : i32
    %c0_i32_0 = arith.constant 0 : i32
    return %arg0, %arg1, %c0_i32 : i32, i32, i32
  }
  func.func @transform_2(%arg0: i32, %arg1: i32) -> (i32, i32) {
    %c0_i32 = arith.constant 0 : i32
    %c0_i32_0 = arith.constant 0 : i32
    %c0_i32_1 = arith.constant 0 : i32
    return %c0_i32, %c0_i32_0 : i32, i32
  }
  func.func @transform_3(%arg0: i32, %arg1: i32) -> (i32, i32) {
    %c0_i32 = arith.constant 0 : i32
    %c0_i32_0 = arith.constant 0 : i32
    %c0_i32_1 = arith.constant 0 : i32
    return %c0_i32, %c0_i32_0 : i32, i32
  }
  func.func @transform_4(%arg0: i32, %arg1: i32) -> (i32, i32) {
    %c0_i32 = arith.constant 0 : i32
    %c0_i32_0 = arith.constant 0 : i32
    %c0_i32_1 = arith.constant 0 : i32
    return %c0_i32, %c0_i32_0 : i32, i32
  }
  func.func @transform_5(%arg0: i32, %arg1: i32) -> (i32, i32) {
    %c0_i32 = arith.constant 0 : i32
    %c0_i32_0 = arith.constant 0 : i32
    %c0_i32_1 = arith.constant 0 : i32
    return %c0_i32, %c0_i32_0 : i32, i32
  }
  func.func @transform_6(%arg0: i32, %arg1: i32) -> (i32, i32) {
    %c0_i32 = arith.constant 0 : i32
    %c0_i32_0 = arith.constant 0 : i32
    %c0_i32_1 = arith.constant 0 : i32
    return %c0_i32, %c0_i32_0 : i32, i32
  }
  func.func @transform_7(%arg0: i32, %arg1: i32) -> (i32, i32) {
    %c0_i32 = arith.constant 0 : i32
    %c0_i32_0 = arith.constant 0 : i32
    %c0_i32_1 = arith.constant 0 : i32
    return %c0_i32, %c0_i32_0 : i32, i32
  }
  func.func @transform_8(%arg0: i32, %arg1: i32) -> (i32, i32) {
    %c0_i32 = arith.constant 0 : i32
    %c0_i32_0 = arith.constant 0 : i32
    %c0_i32_1 = arith.constant 0 : i32
    return %c0_i32, %c0_i32_0 : i32, i32
  }
  func.func @transform_9(%arg0: i32, %arg1: i32) -> (i32, i32) {
    %c0_i32 = arith.constant 0 : i32
    %c0_i32_0 = arith.constant 0 : i32
    %c0_i32_1 = arith.constant 0 : i32
    return %c0_i32, %c0_i32_0 : i32, i32
  }
  func.func @transform_10(%arg0: i32, %arg1: i32) -> (i32, i32) {
    %c0_i32 = arith.constant 0 : i32
    %c0_i32_0 = arith.constant 0 : i32
    %c0_i32_1 = arith.constant 0 : i32
    return %c0_i32, %c0_i32_0 : i32, i32
  }
  func.func @transform_11(%arg0: i32, %arg1: i32) -> (i32, i32) {
    %c0_i32 = arith.constant 0 : i32
    %c0_i32_0 = arith.constant 0 : i32
    %c0_i32_1 = arith.constant 0 : i32
    return %c0_i32, %c0_i32_0 : i32, i32
  }
  func.func @transform_12(%arg0: i32, %arg1: i32) -> (i32, i32) {
    %c0_i32 = arith.constant 0 : i32
    %c0_i32_0 = arith.constant 0 : i32
    %c0_i32_1 = arith.constant 0 : i32
    return %c0_i32, %c0_i32_0 : i32, i32
  }
  func.func @transform_13(%arg0: i32, %arg1: i32) -> (i32, i32, i32) {
    %c0_i32 = arith.constant 0 : i32
    %c0_i32_0 = arith.constant 0 : i32
    return %arg0, %arg1, %c0_i32 : i32, i32, i32
  }
  func.func @transform_14(%arg0: i32, %arg1: i32) -> (i32, i32, i32) {
    %c0_i32 = arith.constant 0 : i32
    %c0_i32_0 = arith.constant 0 : i32
    return %arg0, %arg1, %c0_i32 : i32, i32, i32
  }
}

</mosaic_0001>

<bundles_post_ra>
// kernel: mamba_block_forward.1
= control target key start
LH: loop header
LB: loop body
LE: loop exit
PB: predicated region body
PF: predicated region fallthrough
CT: control target
= control target key end

     0   :  { %s2420_s0 = inlined_call_operand.vmem [shape: f32[2,8,32], index: 0, kind: input, shape index: {}]   ;;  %s2421_s1 = inlined_call_operand.vmem [shape: f32[2,8,32], index: 1, kind: input, shape index: {}]   ;;  %s2422_s2 = inlined_call_operand.vmem [shape: f32[1,32], index: 2, kind: input, shape index: {}]   ;;  %s2423_s3 = inlined_call_operand.vmem [shape: f32[1,32], index: 3, kind: input, shape index: {}]   ;;  %s2424_s4 = inlined_call_operand.vmem [shape: bf16[32,128], index: 4, kind: input, shape index: {}]   ;;  %s2425_s5 = inlined_call_operand.vmem [shape: f32[4,64], index: 5, kind: input, shape index: {}]   ;;  %s2426_s6 = inlined_call_operand.vmem [shape: f32[1,64], index: 6, kind: input, shape index: {}]   ;;  %s2427_s7 = inlined_call_operand.vmem [shape: bf16[64,34], index: 7, kind: input, shape index: {}]   ;;  %s2428_s8 = inlined_call_operand.vmem [shape: bf16[2,64], index: 8, kind: input, shape index: {}]   ;;  %s2429_s9 = inlined_call_operand.vmem [shape: f32[1,64], index: 9, kind: input, shape index: {}]   ;;  %s2430_s10 = inlined_call_operand.vmem [shape: f32[16,64], index: 10, kind: input, shape index: {}]   ;;  %s2431_s11 = inlined_call_operand.vmem [shape: f32[1,64], index: 11, kind: input, shape index: {}]   ;;  %s2432_s12 = inlined_call_operand.vmem [shape: bf16[64,32], index: 12, kind: input, shape index: {}]   ;;  %s2433_s13 = inlined_call_operand.hbm [shape: f32[2,8,32], index: 13, kind: output, shape index: {0}]   ;;  %s2434_s14 = inlined_call_operand.hbm [shape: f32[2,8,32], index: 14, kind: output, shape index: {1}]  }
   0x1   :  { %2440 = sst [smem:[#allocation18_spill]] %s2420_s0 }
   0x2   :  { %2441 = sst [smem:[#allocation19_spill]] %s2421_s1 }
   0x3   :  { %2442 = sst [smem:[#allocation20_spill]] %s2422_s2 }
   0x4   :  { %20 = vsyncpa [#allocation10], 0 }
   0x5   :  { %22 = vsyncpa [#allocation10 + $0x1], 0 }
   0x6   :  { %23 = vsyncpa [#allocation12], 0 }
   0x7   :  { %25 = vsyncpa [#allocation12 + $0x1], 0  ;;  %s1962_s29 = smov 0   ;;  %s1964_s30 = smov 0  }
   0x8   :  { %s1966_s15 = smov 0   ;;  %s1968_s16 = smov 0  }
   0x9   :  { %s1970_s17 = smov 0   ;;  %s1972_s18 = smov 0  }
   0xa LB: > { %2443 = sst [smem:[#allocation15_spill]] %s1858_s29  ;;  %s1556_s19 = sadd.s32 4294967295, %s1878_s18   ;;  %s1878_s18 = sphi %s1972_s18, %s31_s18   ;;  %s1874_s17 = sphi %s1970_s17, %s2455_s17   ;;  %s1870_s16 = sphi %s1968_s16, %s2454_s16   ;;  %s1866_s15 = sphi %s1966_s15, %s2458_s15   ;;  %s1862_s30 = sphi %s1964_s30, %s2457_s30   ;;  %s1858_s29 = sphi %s1962_s29, %s2456_s29  }
   0xb   : > { %2444 = sst [smem:[#allocation16_spill]] %s1874_s17  ;;  %s1557_s20 = sadd.s32 4294967294, %s1878_s18  }
   0xc   : > { %s43_s21 = sadd.s32 1, %s1874_s17  ;;  %s339_s22 = sadd.s32 1, %s1866_s15 }
   0xd   : > { %p45_p0 = scmp.ge.s32.totalorder %s43_s21, 2  ;;  %p349_p1 = scmp.ne.s32.totalorder %s1866_s15, %s1862_s30 }
   0xe   : > { %p350_p2 = scmp.eq.s32.totalorder %s1556_s19, 1  ;;  %p355_p3 = scmp.ne.s32.totalorder %s1862_s30, %s1858_s29 }
   0xf   : > { %s2460_s21 = smov (%p45_p0, %s43_s21), 0  ;;  %p356_p5 = scmp.eq.s32.totalorder %s1557_s20, 1 }
  0x10   : > { %2445 = sst [smem:[#allocation17_spill]] %s2460_s21  ;;  %p2002_p4 = por %p350_p2, %p349_p1 }
  0x11   : > { %s334_s24 = ssub.s32 %s1874_s17, %s2460_s21  ;;  %p1560_p6 = scmp.ge.s32.totalorder %s1878_s18, 1 }
  0x12   : > { %p337_p7 = scmp.eq.s32.totalorder %s334_s24, 0  ;;  %p2009_p8 = por %p356_p5, %p355_p3 }
  0x13   : > { %p455_p9 = scmp.lt.s32.totalorder %s1878_s18, 3 }
  0x14   : > { %s2015_s26 = scalar_select %p337_p7, %s1866_s15, %s339_s22  }
  0x15   : > { %p456_p10 = pnand %p1560_p6, %p455_p9 }
  0x16   : > { %p515_p11 = scmp.lt.s32.totalorder (!%p456_p10), %s1870_s16, 1  ;;  %s2448_s0 = sld [smem:[#allocation18_spill]] (!%p456_p10)  ;;  %vm533_vm0 = vcmask (!%p456_p10), 261120   ;;  %v1712_v9 = vld [vmem:[%s2424_s4] sm:$0xff] (!%p456_p10)   ;;  %v1880_v10 = vmov (!%p456_p10), 0.0   ;;  %vm1881_vm1 = vmmov (!%p456_p10), 0   ;;  %v651_v27 = vlaneseq (!%p456_p10) }
  0x17   : > { %459 = sbr.rel (%p456_p10) target bundleno = 1398 (0x576), region = 72  ;;  %s2449_s1 = sld [smem:[#allocation19_spill]] (!%p456_p10)  ;;  %1609 = vmatprep.subr.bf16.mxu1 (!%p456_p10), %v1880_v10  ;;  %1613 = vmatprep.mubr.msk.bf16.mxu1 (!%p456_p10), %vm1881_vm1, %v1880_v10  ;;  %v1713_v11 = vld [vmem:[%s2424_s4 + $0x8] sm:$0xff] (!%p456_p10)   ;;  %v1566_v18 = vld [vmem:[%s2423_s3] ss:$0 sm:$0xff] (!%p456_p10)  ;;  %vm629_vm2 = vcmask (!%p456_p10), 523264  }
  0x18   : > { %1610 = vmatpush3.bf16.msra.mxu1 (!%p456_p10), %v1712_v9  ;;  %1629 = vmatprep.subr.bf16.mxu0 (!%p456_p10), %v1880_v10  ;;  %s2450_s2 = sld [smem:[#allocation20_spill]] (!%p456_p10)  ;;  %630 = vst.msk [vmem:[#allocation2] sm:$0xff] (!%p456_p10), %vm629_vm2, %v1880_v10  ;;  %855 = vst.msk [vmem:[#allocation8] sm:$0xff] (!%p456_p10), %vm629_vm2, %v1880_v10  ;;  %v1714_v22 = vld [vmem:[%s2427_s7] sm:$0xff] (!%p456_p10)   ;;  %v1715_v23 = vld [vmem:[%s2427_s7 + $0x8] sm:$0xff] (!%p456_p10)   ;;  %v2079_v32 = vshrl.u32 (!%p456_p10), %v651_v27, 7 }
  0x19   : > { %1611 = vmatprep.subr.bf16.mxu1 (!%p456_p10), %v1880_v10  ;;  %1631 = vmatprep.mubr.msk.bf16.mxu0 (!%p456_p10), %vm1881_vm1, %v1880_v10  ;;  %856 = vst.msk [vmem:[#allocation8 + $0x8] sm:$0xff] (!%p456_p10), %vm629_vm2, %v1880_v10  ;;  %v1716_v24 = vld [vmem:[%s2427_s7 + $0x10] sm:$0xff] (!%p456_p10)   ;;  %v1717_v25 = vld [vmem:[%s2427_s7 + $0x18] sm:$0xff] (!%p456_p10)   ;;  %v1571_v37 = vld [vmem:[%s2425_s5] ss:$0 sm:$0xff] (!%p456_p10)  ;;  %vm796_vm6 = vcmask (!%p456_p10), 1040384  }
  0x1a   : > { %vm653_vm3 = vcmp.lt.s32.totalorder (!%p456_p10), %v2079_v32, 3  ;;  %vm664_vm4 = vcmp.lt.s32.totalorder (!%p456_p10), %v2079_v32, 2  ;;  %vm675_vm5 = vcmp.lt.s32.totalorder (!%p456_p10), %v2079_v32, 1  ;;  %v1570_v41 = vld [vmem:[%s2426_s6] ss:$0 sm:$0xff] (!%p456_p10)  ;;  %vm792_vm7 = vcmask (!%p456_p10), 15360  }
  0x1b   : > { %v1572_v44 = vld [vmem:[%s2425_s5 + $0x1] ss:$0 sm:$0xff] (!%p456_p10)  ;;  %v1573_v47 = vld [vmem:[%s2425_s5 + $0x2] ss:$0 sm:$0xff] (!%p456_p10)  ;;  %v1574_v50 = vld [vmem:[%s2425_s5 + $0x3] ss:$0 sm:$0xff] (!%p456_p10) }
  0x1c   : > { %1612 = vmatpush3.bf16.msra.mxu1 (!%p456_p10), %v1713_v11  ;;  %v784_v63 = vld [vmem:[%s2428_s8] sm:$0x1] (!%p456_p10)  ;;  %s1882_s21 = smov (!%p456_p10), 126   ;;  %vm777_vm8 = vcmask (!%p456_p10), 130048   ;;  %v2112_v9 = vsub.s32 (!%p456_p10), 0, %v2079_v32  ;;  %s1884_s22 = smov (!%p456_p10), 64  }
  0x1d   : > { %1617 = vmatprep.subr.bf16.mxu1 (!%p456_p10), %v1880_v10  ;;  %vm1290_vm9 = vcmask (!%p456_p10), 1041408   ;;  %vm1292_vm10 = vcmask (!%p456_p10), 1042432   ;;  %vm1294_vm11 = vcmask (!%p456_p10), 1043456   ;;  %vm1296_vm12 = vcmask (!%p456_p10), 1044480  }
  0x1e   : > { %s516_s27 = scalar_select %p515_p11, %s1870_s16, 1  ;;  %v1565_v16 = vld [vmem:[%s2450_s2] ss:$0 sm:$0xff]  ;;  %vm1298_vm13 = vcmask 1045504   ;;  %vm1300_vm14 = vcmask 1046528  }
  0x1f   : > { %v640_v31 = vld [vmem:[#allocation2] sm:$0xff] }
  0x20   : > { %s1563_s28 = sshll.u32 %s516_s27, 3  ;;  %v649_v33 = vrot.slane %v640_v31, 5  ;;  %v662_v34 = vrot.slane %v640_v31, 6  ;;  %v673_v39 = vrot.slane %v640_v31, 7  ;;  %s2439_s27 = sshll.u32 %s1870_s16, 7 }
  0x21   : > { %s521_s20 = scalar_lea.vmem %s2448_s0, %s1563_s28  ;;  %s528_s17 = scalar_lea.vmem %s2449_s1, %s1563_s28 }
  0x22   : > { %v530_v0 = vld [vmem:[%s521_s20] sm:$0xff]  ;;  %s2344_s24 = scalar_lea.hbm %s2434_s14, %s2439_s27  ;;  %s1885_s1 = smov [#allocation11]  }
  0x23   : > { %v531_v1 = vld [vmem:[%s528_s17] sm:$0xff]  ;;  %s1883_s17 = smov 110   ;;  %s1772_s2 = sshll.u32 %s1885_s1, 4  ;;  %s1773_s2 = int_to_ptr.vmem [resolvable:$false] %s1772_s2 }
  0x24   : > { %v2025_v2 = vadd.f32 %v531_v1, %v530_v0  ;;  %v798_v0 = vsel %vm796_vm6, %v784_v63, 0 }
  0x25   : > { %1630 = vmatpush3.bf16.msra.mxu0 %v798_v0 }
  0x26   : > { %v535_v3 = vsel %vm533_vm0, %v2025_v2, 0.0  ;;  %1635 = vmatprep.subr.bf16.mxu0 %v1880_v10 }
  0x27   : > { %536 = vadd.xlane.f32.xlu0 %v535_v3 }
  0xb4   : > { %v537_v4 = vpop.xlane.xlu0 %536 }
  0xb5   : > { %v539_v5 = vmul.f32 0.03125, %v537_v4 }
  0xb7   : > { %v540_v6 = vsub.f32 %v2025_v2, %v539_v5 }
  0xb9   : > { %v541_v7 = vmul.f32 %v540_v6, %v540_v6 }
  0xbb   : > { %v542_v8 = vsel %vm533_vm0, %v541_v7, 0.0 }
  0xbc   : > { %543 = vadd.xlane.f32.xlu0 %v542_v8 }
 0x149   : > { %v544_v12 = vpop.xlane.xlu0 %543 }
 0x14a   : > { %v545_v13 = vmul.f32 0.03125, %v544_v12 }
 0x14c   : > { %v546_v14 = vadd.f32 1e-05, %v545_v13  ;;  %v2116_v13 = vsub.s32 1, %v2079_v32 }
 0x14e   : > { %1722 = vrsqrt.f32 %v546_v14  ;;  %v2119_v14 = vsub.s32 3, %v2079_v32 }
 0x158   : > { %v1723_v15 = vpop.eup %1722 }
 0x159   : > { %v548_v17 = vmul.f32 %v1723_v15, %v540_v6 }
 0x15b   : > { %v556_v19 = vmul.f32 %v1565_v16, %v548_v17  ;;  %v2124_v17 = vsub.s32 4, %v2079_v32 }
 0x15d   : > { %v564_v20 = vadd.f32 %v1566_v18, %v556_v19  ;;  %v2128_v19 = vsub.s32 2, %v2079_v32 }
 0x15f   : > { %v565_v21 = vpack.c.bf16 %v564_v20, %v564_v20  ;;  %v2131_v20 = vsub.s32 5, %v2079_v32 }
 0x161   : > { %1614 = vmatmul.mubr.msk.bf16.vlgmr.msra.gmra.mrb[0].mxu1 %vm533_vm0, %v565_v21 }
 0x162   : > { %1625 = vmatprep.mubr.msk.bf16.mxu1 %vm1881_vm1, %v1880_v10  ;;  %1618 = vmatpush3.bf16.msra.mxu1 %v1714_v22 }
 0x163   : > { %1619 = vmatprep.subr.bf16.mxu1 %v1880_v10 }
 0x166   : > { %1620 = vmatpush3.bf16.msra.mxu1 %v1715_v23  ;;  %v2136_v23 = vsub.s32 6, %v2079_v32 }
 0x167   : > { %1621 = vmatprep.subr.bf16.mxu1 %v1880_v10 }
 0x16a   : > { %1622 = vmatpush3.bf16.msra.mxu1 %v1716_v24 }
 0x16b   : > { %1623 = vmatprep.subr.bf16.mxu1 %v1880_v10 }
 0x16e   : > { %1624 = vmatpush3.bf16.msra.mxu1 %v1717_v25 }
 0x234   : > { %v2075_v26 = vpop.f32.mrb[0].mxu1 }
 0x235   : > { %639 = vst.msk [vmem:[#allocation2 + $0x8] sm:$0xff] %vm629_vm2, %v2075_v26  ;;  %v1615_v28 = vpop.f32.mrb[1].mxu1 }
 0x236   : > { %v622_v29 = vpop.f32.mrb[2].mxu1 }
 0x237   : > { %v1616_v30 = vpop.f32.mrb[3].mxu1 }
 0x238   : > { %v2143_v30 = vsub.s32 7, %v2079_v32 }
 0x23c   : > { %v641_v35 = vld [vmem:[#allocation2 + $0x8] sm:$0xff] }
 0x23d   : > { %v650_v36 = vrot.slane %v641_v35, 5  ;;  %v663_v38 = vrot.slane %v641_v35, 6  ;;  %v674_v40 = vrot.slane %v641_v35, 7  ;;  %v689_v54 = vmul.f32 %v1574_v50, %v641_v35 }
 0x23f   : > { %v654_v42 = vsel %vm653_vm3, %v649_v33, %v650_v36  ;;  %v665_v43 = vsel %vm664_vm4, %v662_v34, %v663_v38  ;;  %v676_v46 = vsel %vm675_vm5, %v673_v39, %v674_v40  ;;  %v1315_v33 = vsub.f32 0.0, %v2075_v26 }
 0x240   : > { %v660_v45 = vmul.f32 %v1571_v37, %v654_v42  ;;  %v671_v49 = vmul.f32 %v1572_v44, %v665_v43  ;;  %v682_v52 = vmul.f32 %v1573_v47, %v676_v46  ;;  %v1580_v43 = vld [vmem:[%s2429_s9] ss:$0 sm:$0xff] }
 0x241   : > { %v1316_v35 = vmul.f32 1.442695, %v1315_v33  ;;  %v1718_v47 = vld [vmem:[%s2432_s12] sm:$0xff]  }
 0x242   : > { %v661_v48 = vadd.f32 %v1570_v41, %v660_v45 }
 0x244   : > { %v672_v51 = vadd.f32 %v671_v49, %v661_v48 }
 0x246   : > { %v683_v53 = vadd.f32 %v682_v52, %v672_v51 }
 0x248   : > { %v690_v55 = vadd.f32 %v689_v54, %v683_v53  ;;  %v1720_v53 = vld [vmem:[%s2432_s12 + $0x10] sm:$0xff]   ;;  %v1721_v54 = vld [vmem:[%s2432_s12 + $0x18] sm:$0xff]  }
 0x24a   : > { %v691_v56 = vsub.f32 0.0, %v690_v55 }
 0x24c   : > { %v692_v57 = vmul.f32 1.442695, %v691_v56 }
 0x24e   : > { %1724 = vpow2.f32 %v692_v57 }
 0x258   : > { %v1725_v58 = vpop.eup %1724 }
 0x259   : > { %v694_v59 = vadd.f32 1.0, %v1725_v58 }
 0x25b   : > { %1726 = vrcp.f32 %v694_v59 }
 0x25c   : > { %1728 = vpow2.f32 %v1316_v35 }
 0x265   : > { %v1727_v60 = vpop.eup %1726 }
 0x266   : > { %v2099_v61 = vmul.f32 %v1727_v60, %v690_v55  ;;  %v1729_v38 = vpop.eup %1728 }
 0x267   : > { %v1318_v40 = vadd.f32 1.0, %v1729_v38 }
 0x268   : > { %v697_v62 = vpack.c.bf16 %v2099_v61, %v2099_v61 }
 0x269   : > { %1730 = vrcp.f32 %v1318_v40 }
 0x26a   : > { %1626 = vmatmul.mubr.msk.bf16.vlgmr.msra.gmra.mrb[4].mxu1 %vm629_vm2, %v697_v62 }
 0x273   : > { %v1731_v41 = vpop.eup %1730 }
 0x274   : > { %v1320_v42 = vmul.f32 %v1731_v41, %v2075_v26  ;;  %v1719_v26 = vld [vmem:[%s2432_s12 + $0x8] sm:$0xff]  }
 0x33d   : > { %v767_v1 = vpop.f32.mrb[4].mxu1 }
 0x33e   : > { %v783_v3 = vpack.c.bf16 %v767_v1, %v767_v1  ;;  %774 = vrot.lane.b32.xlu1 %v767_v1, %s1882_s21  ;;  %v1627_v4 = vpop.f32.mrb[5].mxu1 }
 0x33f   : > { %v770_v5 = vpop.f32.mrb[6].mxu1 }
 0x340   : > { %v1628_v6 = vpop.f32.mrb[7].mxu1  ;;  %1632 = vmatmul.mubr.msk.bf16.vlgmr.msra.gmra.mrb[0].mxu0 %vm792_vm7, %v783_v3 }
 0x341   : > { %1643 = vmatprep.mubr.msk.bf16.mxu0 %vm1881_vm1, %v1880_v10  ;;  %1636 = vmatpush3.bf16.msra.mxu0 %v1718_v47  ;;  %v860_v47 = vld [vmem:[#allocation8 + $0x8] sm:$0xff] }
 0x342   : > { %779 = vrot.lane.b32.xlu1 %v767_v1, %s1883_s17  ;;  %1637 = vmatprep.subr.bf16.mxu0 %v1880_v10  ;;  %s2331_s17 = sand.u32 1, %s1862_s30  }
 0x343   : > { %s1409_s21 = scalar_lea.sflag [#allocation12], %s2331_s17 }
 0x345   : > { %1638 = vmatpush3.bf16.msra.mxu0 %v1719_v26 }
 0x346   : > { %1639 = vmatprep.subr.bf16.mxu0 %v1880_v10 }
 0x349   : > { %1640 = vmatpush3.bf16.msra.mxu0 %v1720_v53 }
 0x34a   : > { %1641 = vmatprep.subr.bf16.mxu0 %v1880_v10 }
 0x34d   : > { %1642 = vmatpush3.bf16.msra.mxu0 %v1721_v54 }
 0x3b0   : > { %v775_v7 = vpop.permute.xlu1 %774 }
 0x3b1   : > { %778 = vst.msk [vmem:[#allocation5] sm:$0xff] %vm777_vm8, %v775_v7 }
 0x3b4   : > { %v780_v8 = vpop.permute.xlu1 %779 }
 0x3b5   : > { %782 = vst.msk [vmem:[#allocation6] sm:$0xff] %vm777_vm8, %v780_v8 }
 0x3b8   : > { %v863_v11 = vld [vmem:[#allocation5] sm:$0xff] }
 0x3b9   : > { %v948_v12 = vrot.slane %v863_v11, %v2112_v9  ;;  %v965_v15 = vrot.slane %v863_v11, %v2116_v13  ;;  %v999_v16 = vrot.slane %v863_v11, %v2119_v14  ;;  %v1016_v18 = vrot.slane %v863_v11, %v2124_v17 }
 0x3ba   : > { %v982_v21 = vrot.slane %v863_v11, %v2128_v19  ;;  %v1033_v22 = vrot.slane %v863_v11, %v2131_v20  ;;  %v1050_v24 = vrot.slane %v863_v11, %v2136_v23  ;;  %v1067_v31 = vrot.slane %v863_v11, %v2143_v30 }
 0x3bb   : > { %954 = vbcast.lane.b32.xlu1 %v948_v12, 264  ;;  %950 = vbcast.lane.b32.xlu0 %v948_v12, 256  ;;  %v2197_v12 = vld [vmem:[%s2430_s10 + $0x8] sm:$0xff] }
 0x3bc   : > { %v864_v25 = vld [vmem:[#allocation6] sm:$0xff] }
 0x3bd   : > { %v1084_v27 = vrot.slane %v864_v25, %v2112_v9  ;;  %v1095_v28 = vrot.slane %v864_v25, %v2116_v13  ;;  %v1106_v29 = vrot.slane %v864_v25, %v2128_v19  ;;  %v1117_v34 = vrot.slane %v864_v25, %v2119_v14 }
 0x3be   : > { %v1128_v36 = vrot.slane %v864_v25, %v2124_v17  ;;  %v1139_v32 = vrot.slane %v864_v25, %v2131_v20  ;;  %v1150_v37 = vrot.slane %v864_v25, %v2136_v23  ;;  %v1161_v39 = vrot.slane %v864_v25, %v2143_v30 }
 0x3bf   : > { %967 = vbcast.lane.b32.xlu1 %v965_v15, 256  ;;  %1005 = vbcast.lane.b32.xlu0 %v999_v16, 264 }
 0x3c3   : > { %971 = vbcast.lane.b32.xlu1 %v965_v15, 264  ;;  %1022 = vbcast.lane.b32.xlu0 %v1016_v18, 264 }
 0x3c7   : > { %984 = vbcast.lane.b32.xlu1 %v982_v21, 256  ;;  %1039 = vbcast.lane.b32.xlu0 %v1033_v22, 264 }
 0x3cb   : > { %988 = vbcast.lane.b32.xlu1 %v982_v21, 264  ;;  %1056 = vbcast.lane.b32.xlu0 %v1050_v24, 264 }
 0x3cf   : > { %1001 = vbcast.lane.b32.xlu1 %v999_v16, 256  ;;  %1090 = vbcast.lane.b32.xlu0 %v1084_v27, 264 }
 0x3d3   : > { %1018 = vbcast.lane.b32.xlu1 %v1016_v18, 256  ;;  %1101 = vbcast.lane.b32.xlu0 %v1095_v28, 264 }
 0x3d7   : > { %1035 = vbcast.lane.b32.xlu1 %v1033_v22, 256  ;;  %1112 = vbcast.lane.b32.xlu0 %v1106_v29, 264 }
 0x3db   : > { %1052 = vbcast.lane.b32.xlu1 %v1050_v24, 256  ;;  %1073 = vbcast.lane.b32.xlu0 %v1067_v31, 264 }
 0x3df   : > { %1123 = vbcast.lane.b32.xlu0 %v1117_v34, 264  ;;  %1086 = vbcast.lane.b32.xlu1 %v1084_v27, 256  ;;  %v2215_v27 = vld [vmem:[%s2430_s10] sm:$0xff] }
 0x3e3   : > { %1134 = vbcast.lane.b32.xlu0 %v1128_v36, 264  ;;  %1097 = vbcast.lane.b32.xlu1 %v1095_v28, 256 }
 0x3e7   : > { %1145 = vbcast.lane.b32.xlu0 %v1139_v32, 264  ;;  %1108 = vbcast.lane.b32.xlu1 %v1106_v29, 256 }
 0x3eb   : > { %1156 = vbcast.lane.b32.xlu0 %v1150_v37, 264  ;;  %1069 = vbcast.lane.b32.xlu1 %v1067_v31, 256 }
 0x3ef   : > { %1167 = vbcast.lane.b32.xlu0 %v1161_v39, 264  ;;  %1119 = vbcast.lane.b32.xlu1 %v1117_v34, 256 }
 0x3f3   : > { %1130 = vbcast.lane.b32.xlu1 %v1128_v36, 256 }
 0x3f7   : > { %1141 = vbcast.lane.b32.xlu1 %v1139_v32, 256 }
 0x3fb   : > { %1152 = vbcast.lane.b32.xlu1 %v1150_v37, 256 }
 0x3ff   : > { %1163 = vbcast.lane.b32.xlu1 %v1161_v39, 256 }
 0x403   : > { %1322 = vrot.lane.b32.xlu1 %v1320_v42, %s1884_s22  ;;  %s2438_s22 = sshll.u32 %s2331_s17, 3 }
 0x404   : > { %s514_s28 = scalar_lea.vmem [#allocation11], %s2438_s22  ;;  %s1774_s22 = scalar_lea.vmem %s1773_s2, 256 }
 0x405   : > { %534 = vst.msk [vmem:[%s514_s28] sm:$0xff] %vm533_vm0, %v2025_v2  ;;  %s1437_s29 = sshll.u32 %s514_s28, 4  ;;  %s1438_s29 = int_to_ptr.vmem [resolvable:$true] %s1437_s29 }
 0x406   : > { %s1768_s0 = scalar_lea.vmem %s1438_s29, 128  ;;  %p1775_p1 = scmp.lt.s32.totalorder %s1438_s29, %s1773_s2 }
 0x407   : > { %p1769_p12 = scmp.ne.s32.totalorder %s1438_s29, %s1768_s0  ;;  %p1776_p2 = scmp.lt.s32.totalorder %s1774_s22, %s1768_s0 }
 0x409   : > { %p1770_p13 = pnand %p1769_p12, %p2002_p4  ;;  %p1777_p3 = por %p1776_p2, %p1775_p1 }
 0x40b   : > { %p1771_p0 = pneg %p1770_p13 }
 0x40d   : > { %p1778_p5 = pnand %p1777_p3, %p1771_p0 }
 0x413   : > { %v834_v44 = vpop.f32.mrb[0].mxu0 }
 0x414   : > { %v835_v45 = vadd.f32 %v1580_v43, %v834_v44  ;;  %v1633_v46 = vpop.f32.mrb[1].mxu0 }
 0x415   : > { %v837_v48 = vpop.f32.mrb[2].mxu0 }
 0x416   : > { %v841_v49 = vand.u32 2147483647, %v835_v45  ;;  %v1634_v50 = vpop.f32.mrb[3].mxu0  ;;  %v840_v63 = vmax.f32 %v835_v45, 0.0 }
 0x418   : > { %v842_v51 = vsub.f32 0.0, %v841_v49 }
 0x41a   : > { %v843_v52 = vmul.f32 1.442695, %v842_v51 }
 0x41c   : > { %1732 = vpow2.f32 %v843_v52 }
 0x426   : > { %v1733_v55 = vpop.eup %1732 }
 0x427   : > { %v845_v56 = vadd.f32 1.0, %v1733_v55 }
 0x429   : > { %1734 = vlog2.f32 %v845_v56 }
 0x42d   : > { %v2171_v57 = vpop.permute.xlu0 %950  ;;  %v955_v58 = vpop.permute.xlu1 %954 }
 0x431   : > { %v2173_v59 = vpop.permute.xlu0 %1005  ;;  %v2175_v60 = vpop.permute.xlu1 %967 }
 0x433   : > { %v1735_v62 = vpop.eup %1734 }
 0x434   : > { %v847_v0 = vmul.f32 0.6931472, %v1735_v62 }
 0x435   : > { %v2177_v1 = vpop.permute.xlu0 %1022  ;;  %v2179_v3 = vpop.permute.xlu1 %971 }
 0x436   : > { %v848_v4 = vadd.f32 %v847_v0, %v840_v63 }
 0x438   : > { %849 = vst.msk [vmem:[#allocation3] sm:$0xff] %vm629_vm2, %v848_v4  ;;  %v850_v10 = vmul.f32 %v848_v4, %v2099_v61 }
 0x439   : > { %v2183_v5 = vpop.permute.xlu0 %1039  ;;  %v2185_v6 = vpop.permute.xlu1 %984 }
 0x43a   : > { %851 = vst.msk [vmem:[#allocation4] sm:$0xff] %vm629_vm2, %v850_v10 }
 0x43d   : > { %v2188_v7 = vpop.permute.xlu1 %988  ;;  %v2190_v8 = vpop.permute.xlu0 %1056 }
 0x43f   : > { %v2192_v11 = vld [vmem:[#allocation3] sm:$0xff] }
 0x440   : > { %v868_v15 = vrot.slane %v2192_v11, %v2112_v9  ;;  %v878_v21 = vrot.slane %v2192_v11, %v2116_v13  ;;  %v888_v24 = vrot.slane %v2192_v11, %v2128_v19  ;;  %v898_v33 = vrot.slane %v2192_v11, %v2119_v14 }
 0x441   : > { %v2201_v16 = vpop.permute.xlu1 %1001  ;;  %v2206_v22 = vpop.permute.xlu0 %1090  ;;  %v2227_v39 = vld [vmem:[#allocation4] sm:$0xff]  ;;  %v908_v42 = vrot.slane %v2192_v11, %v2124_v17  ;;  %v918_v26 = vrot.slane %v2192_v11, %v2131_v20  ;;  %v928_v0 = vrot.slane %v2192_v11, %v2136_v23 }
 0x442   : > { %v870_v18 = vmul.f32 %v868_v15, %v2197_v12  ;;  %v880_v29 = vmul.f32 %v878_v21, %v2197_v12  ;;  %v890_v31 = vmul.f32 %v888_v24, %v2197_v12  ;;  %v869_v34 = vmul.f32 %v868_v15, %v2215_v27 }
 0x443   : > { %v879_v38 = vmul.f32 %v878_v21, %v2215_v27  ;;  %v900_v41 = vmul.f32 %v898_v33, %v2197_v12  ;;  %v889_v45 = vmul.f32 %v888_v24, %v2215_v27  ;;  %v959_v46 = vrot.slane %v2227_v39, %v2112_v9  ;;  %v859_v21 = vld [vmem:[#allocation8] sm:$0xff] }
 0x444   : > { %v873_v28 = vmul.f32 1.442695, %v870_v18  ;;  %v883_v35 = vmul.f32 1.442695, %v880_v29  ;;  %v871_v37 = vmul.f32 1.442695, %v869_v34  ;;  %v910_v50 = vmul.f32 %v908_v42, %v2197_v12 }
 0x445   : > { %v2210_v25 = vpop.permute.xlu1 %1018  ;;  %v2224_v32 = vpop.permute.xlu0 %1101  ;;  %v893_v40 = vmul.f32 1.442695, %v890_v31  ;;  %v881_v44 = vmul.f32 1.442695, %v879_v38  ;;  %v903_v49 = vmul.f32 1.442695, %v900_v41  ;;  %v899_v54 = vmul.f32 %v898_v33, %v2215_v27 }
 0x446   : > { %1736 = vpow2.f32 %v873_v28  ;;  %v891_v53 = vmul.f32 1.442695, %v889_v45  ;;  %v961_v55 = vmul.f32 %v959_v46, %v955_v58  ;;  %v976_v9 = vrot.slane %v2227_v39, %v2116_v13 }
 0x447   : > { %1738 = vpow2.f32 %v883_v35  ;;  %v913_v62 = vmul.f32 1.442695, %v910_v50  ;;  %v920_v63 = vmul.f32 %v918_v26, %v2197_v12  ;;  %v901_v24 = vmul.f32 1.442695, %v899_v54 }
 0x448   : > { %1740 = vpow2.f32 %v871_v37  ;;  %v909_v58 = vmul.f32 %v908_v42, %v2215_v27  ;;  %v978_v13 = vmul.f32 %v976_v9, %v2179_v3  ;;  %v993_v28 = vrot.slane %v2227_v39, %v2128_v19 }
 0x449   : > { %v2222_v36 = vpop.permute.xlu1 %1035  ;;  %v2237_v48 = vpop.permute.xlu0 %1112  ;;  %1742 = vpow2.f32 %v893_v40  ;;  %v923_v33 = vmul.f32 1.442695, %v920_v63  ;;  %v930_v34 = vmul.f32 %v928_v0, %v2197_v12  ;;  %v938_v35 = vrot.slane %v2192_v11, %v2143_v30 }
 0x44a   : > { %1744 = vpow2.f32 %v881_v44  ;;  %v960_v37 = vmul.f32 %v959_v46, %v2171_v57  ;;  %v1010_v3 = vrot.slane %v2227_v39, %v2119_v14  ;;  %v911_v19 = vmul.f32 1.442695, %v909_v58 }
 0x44b   : > { %1746 = vpow2.f32 %v903_v49  ;;  %v919_v44 = vmul.f32 %v918_v26, %v2215_v27  ;;  %v2265_v45 = vrot.slane %v2227_v39, %v2124_v17  ;;  %v933_v50 = vmul.f32 1.442695, %v930_v34 }
 0x44c   : > { %1748 = vpow2.f32 %v891_v53  ;;  %v977_v14 = vmul.f32 %v976_v9, %v2175_v60  ;;  %v2272_v53 = vrot.slane %v2227_v39, %v2131_v20  ;;  %v939_v34 = vmul.f32 %v938_v35, %v2215_v27 }
 0x44d   : > { %v2232_v43 = vpop.permute.xlu1 %1052  ;;  %v2250_v18 = vpop.permute.xlu0 %1073  ;;  %1750 = vpow2.f32 %v913_v62  ;;  %v929_v62 = vmul.f32 %v928_v0, %v2215_v27  ;;  %v1029_v60 = vmul.f32 %v2265_v45, %v2177_v1 }
 0x44e   : > { %1752 = vpow2.f32 %v901_v24 }
 0x44f   : > { %1754 = vpow2.f32 %v923_v33  ;;  %v931_v1 = vmul.f32 1.442695, %v929_v62 }
 0x450   : > { %v1737_v52 = vpop.eup %1736  ;;  %1756 = vpow2.f32 %v911_v19 }
 0x451   : > { %v2242_v51 = vpop.permute.xlu1 %1086  ;;  %v1170_v56 = vmul.f32 %v1737_v52, %v860_v47  ;;  %v1739_v15 = vpop.eup %1738  ;;  %v995_v47 = vmul.f32 %v993_v28, %v2188_v7  ;;  %v940_v52 = vmul.f32 %v938_v35, %v2197_v12  ;;  %v2278_v7 = vrot.slane %v2227_v39, %v2136_v23 }
 0x452   : > { %v1741_v31 = vpop.eup %1740  ;;  %v1124_v46 = vpop.permute.xlu0 %1123  ;;  %v1012_v12 = vmul.f32 %v1010_v3, %v2173_v59  ;;  %1758 = vpow2.f32 %v933_v50  ;;  %v994_v23 = vmul.f32 %v993_v28, %v2185_v6  ;;  %v941_v35 = vmul.f32 1.442695, %v939_v34 }
 0x453   : > { %v1172_v4 = vadd.f32 %v1170_v56, %v961_v55  ;;  %v1169_v40 = vmul.f32 %v1741_v31, %v859_v21  ;;  %v1743_v42 = vpop.eup %1742  ;;  %v921_v56 = vmul.f32 1.442695, %v919_v44  ;;  %v943_v24 = vmul.f32 1.442695, %v940_v52 }
 0x454   : > { %v1745_v57 = vpop.eup %1744  ;;  %v1063_v62 = vmul.f32 %v2278_v7, %v2190_v8 }
 0x455   : > { %v1098_v10 = vpop.permute.xlu1 %1097  ;;  %v1185_v29 = vmul.f32 %v1739_v15, %v1172_v4  ;;  %v1171_v49 = vadd.f32 %v1169_v40, %v960_v37  ;;  %v1747_v55 = vpop.eup %1746  ;;  %v1174_v59 = vmul.f32 %v1172_v4, %v2206_v22  ;;  %1760 = vpow2.f32 %v921_v56 }
 0x456   : > { %v1749_v63 = vpop.eup %1748  ;;  %v1135_v33 = vpop.permute.xlu0 %1134  ;;  %1762 = vpow2.f32 %v943_v24 }
 0x457   : > { %v1187_v38 = vadd.f32 %v1185_v29, %v978_v13  ;;  %v1184_v54 = vmul.f32 %v1745_v57, %v1171_v49  ;;  %v1751_v31 = vpop.eup %1750  ;;  %1764 = vpow2.f32 %v931_v1 }
 0x458   : > { %v1753_v40 = vpop.eup %1752  ;;  %1766 = vpow2.f32 %v941_v35 }
 0x459   : > { %v1109_v41 = vpop.permute.xlu1 %1108  ;;  %v1200_v11 = vmul.f32 %v1743_v42, %v1187_v38  ;;  %v1186_v9 = vadd.f32 %v1184_v54, %v977_v14  ;;  %v1189_v15 = vmul.f32 %v1187_v38, %v2224_v32  ;;  %v1011_v32 = vmul.f32 %v1010_v3, %v2201_v16  ;;  %v1755_v27 = vpop.eup %1754 }
 0x45a   : > { %v1046_v16 = vmul.f32 %v2272_v53, %v2183_v5  ;;  %v1757_v57 = vpop.eup %1756  ;;  %v1146_v52 = vpop.permute.xlu0 %1145 }
 0x45b   : > { %v1202_v26 = vadd.f32 %v1200_v11, %v995_v47  ;;  %v1188_v13 = vmul.f32 %v1186_v9, %v1098_v10  ;;  %v1199_v29 = vmul.f32 %v1749_v63, %v1186_v9  ;;  %v1191_v6 = vsel %vm629_vm2, %v1189_v15, 0.0 }
 0x45c   : > { %v1759_v56 = vpop.eup %1758 }
 0x45d   : > { %v2274_v17 = vpop.permute.xlu1 %1069  ;;  %v1215_v20 = vmul.f32 %v1747_v55, %v1202_v26  ;;  %v1204_v21 = vmul.f32 %v1202_v26, %v2237_v48  ;;  %v1173_v48 = vmul.f32 %v1171_v49, %v2242_v51  ;;  %v1201_v38 = vadd.f32 %v1199_v29, %v994_v23 }
 0x45e   : > { %v1190_v22 = vsel %vm629_vm2, %v1188_v13, 0.0  ;;  %v1176_v51 = vsel %vm629_vm2, %v1174_v59, 0.0  ;;  %v1157_v59 = vpop.permute.xlu0 %1156 }
 0x45f   : > { %v1217_v58 = vadd.f32 %v1215_v20, %v1012_v12  ;;  %v1206_v10 = vsel %vm629_vm2, %v1204_v21, 0.0  ;;  %v1203_v4 = vmul.f32 %v1201_v38, %v1109_v41  ;;  %v1214_v19 = vmul.f32 %v1753_v40, %v1201_v38  ;;  %v1761_v15 = vpop.eup %1760 }
 0x460   : > { %v1175_v3 = vsel %vm629_vm2, %v1173_v48, 0.0  ;;  %v1028_v41 = vmul.f32 %v2265_v45, %v2210_v25  ;;  %v1192_v50 = vadd.f32 %v1191_v6, %v1190_v22  ;;  %v1078_v12 = vrot.slane %v2227_v39, %v2143_v30  ;;  %v1763_v39 = vpop.eup %1762 }
 0x461   : > { %v1120_v0 = vpop.permute.xlu1 %1119  ;;  %v1230_v37 = vmul.f32 %v1751_v31, %v1217_v58  ;;  %v1219_v28 = vmul.f32 %v1217_v58, %v1124_v46  ;;  %v1205_v11 = vsel %vm629_vm2, %v1203_v4, 0.0  ;;  %v1216_v49 = vadd.f32 %v1214_v19, %v1011_v32  ;;  %v1765_v32 = vpop.eup %1764 }
 0x462   : > { %v1207_v14 = vadd.f32 %v1206_v10, %v1205_v11  ;;  %v1045_v25 = vmul.f32 %v2272_v53, %v2222_v36  ;;  %v1193_v21 = vrot.slane %v1192_v50, 4  ;;  %v1062_v53 = vmul.f32 %v2278_v7, %v2232_v43  ;;  %v1168_v35 = vpop.permute.xlu0 %1167 }
 0x463   : > { %v1232_v42 = vadd.f32 %v1230_v37, %v1029_v60  ;;  %v1221_v46 = vsel %vm629_vm2, %v1219_v28, 0.0  ;;  %v1218_v54 = vmul.f32 %v1216_v49, %v1120_v0  ;;  %v1229_v55 = vmul.f32 %v1757_v57, %v1216_v49 }
 0x464   : > { %v1177_v60 = vadd.f32 %v1176_v51, %v1175_v3  ;;  %v1208_v23 = vrot.slane %v1207_v14, 4  ;;  %v1080_v0 = vmul.f32 %v1078_v12, %v2250_v18  ;;  %v1194_v48 = vadd.f32 %v1193_v21, %v1192_v50 }
 0x465   : > { %v1131_v44 = vpop.permute.xlu1 %1130  ;;  %v1245_v47 = vmul.f32 %v1755_v27, %v1232_v42  ;;  %v1234_v5 = vmul.f32 %v1232_v42, %v1135_v33  ;;  %v1220_v9 = vsel %vm629_vm2, %v1218_v54, 0.0  ;;  %v1231_v63 = vadd.f32 %v1229_v55, %v1028_v41  ;;  %v1767_v27 = vpop.eup %1766 }
 0x466   : > { %v1222_v58 = vadd.f32 %v1221_v46, %v1220_v9  ;;  %v1178_v31 = vrot.slane %v1177_v60, 4  ;;  %v1209_v38 = vadd.f32 %v1208_v23, %v1207_v14  ;;  %v1079_v43 = vmul.f32 %v1078_v12, %v2274_v17 }
 0x467   : > { %v1247_v26 = vadd.f32 %v1245_v47, %v1046_v16  ;;  %v1236_v8 = vsel %vm629_vm2, %v1234_v5, 0.0  ;;  %v1233_v29 = vmul.f32 %v1231_v63, %v1131_v44  ;;  %v1244_v30 = vmul.f32 %v1761_v15, %v1231_v63 }
 0x468   : > { %v1223_v36 = vrot.slane %v1222_v58, 4  ;;  %v1179_v22 = vadd.f32 %v1178_v31, %v1177_v60  ;;  %v1195_v16 = vrot.slane %v1194_v48, 2  ;;  %v1210_v51 = vrot.slane %v1209_v38, 2 }
 0x469   : > { %v1142_v20 = vpop.permute.xlu1 %1141  ;;  %v1260_v45 = vmul.f32 %v1759_v56, %v1247_v26  ;;  %v1249_v24 = vmul.f32 %v1247_v26, %v1146_v52  ;;  %v1235_v1 = vsel %vm629_vm2, %v1233_v29, 0.0  ;;  %v1246_v34 = vadd.f32 %v1244_v30, %v1045_v25 }
 0x46a   : > { %v1237_v40 = vadd.f32 %v1236_v8, %v1235_v1  ;;  %v1224_v4 = vadd.f32 %v1223_v36, %v1222_v58  ;;  %v1180_v46 = vrot.slane %v1179_v22, 2  ;;  %v1196_v54 = vadd.f32 %v1195_v16, %v1194_v48 }
 0x46b   : > { %v1262_v13 = vadd.f32 %v1260_v45, %v1063_v62  ;;  %v1251_v37 = vsel %vm629_vm2, %v1249_v24, 0.0  ;;  %v1248_v18 = vmul.f32 %v1246_v34, %v1142_v20  ;;  %v1259_v42 = vmul.f32 %v1765_v32, %v1246_v34 }
 0x46c   : > { %v1238_v19 = vrot.slane %v1237_v40, 4  ;;  %v1225_v50 = vrot.slane %v1224_v4, 2  ;;  %v1211_v62 = vadd.f32 %v1210_v51, %v1209_v38  ;;  %v1181_v20 = vadd.f32 %v1180_v46, %v1179_v22 }
 0x46d   : > { %v1275_v33 = vmul.f32 %v1763_v39, %v1262_v13  ;;  %v1153_v6 = vpop.permute.xlu1 %1152  ;;  %v1264_v10 = vmul.f32 %v1262_v13, %v1157_v59  ;;  %v1250_v7 = vsel %vm629_vm2, %v1248_v18, 0.0  ;;  %v1261_v44 = vadd.f32 %v1259_v42, %v1062_v53 }
 0x46e   : > { %v1239_v3 = vadd.f32 %v1238_v19, %v1237_v40  ;;  %v1252_v47 = vadd.f32 %v1251_v37, %v1250_v7  ;;  %v1226_v25 = vadd.f32 %v1225_v50, %v1224_v4  ;;  %v1197_v21 = vrot.slane %v1196_v54, 1 }
 0x46f   : > { %v1277_v28 = vadd.f32 %v1275_v33, %v1080_v0  ;;  %v1266_v11 = vsel %vm629_vm2, %v1264_v10, 0.0  ;;  %v1263_v57 = vmul.f32 %v1261_v44, %v1153_v6  ;;  %v1274_v41 = vmul.f32 %v1767_v27, %v1261_v44  ;;  %v1582_v44 = vld [vmem:[%s2431_s11] ss:$0 sm:$0xff] }
 0x470   : > { %v1253_v52 = vrot.slane %v1252_v47, 4  ;;  %v1240_v14 = vrot.slane %v1239_v3, 2  ;;  %v1212_v8 = vrot.slane %v1211_v62, 1  ;;  %v1182_v13 = vrot.slane %v1181_v20, 1 }
 0x471   : > { %1304 = vst.msk [vmem:[#allocation8 + $0x8] sm:$0xff] %vm629_vm2, %v1277_v28  ;;  %v1279_v49 = vmul.f32 %v1277_v28, %v1168_v35  ;;  %v1164_v17 = vpop.permute.xlu1 %1163  ;;  %v1265_v5 = vsel %vm629_vm2, %v1263_v57, 0.0  ;;  %v1276_v26 = vadd.f32 %v1274_v41, %v1079_v43  ;;  %v1227_v29 = vrot.slane %v1226_v25, 1 }
 0x472   : > { %v1254_v55 = vadd.f32 %v1253_v52, %v1252_v47  ;;  %v1267_v56 = vadd.f32 %v1266_v11, %v1265_v5  ;;  %v1241_v63 = vadd.f32 %v1240_v14, %v1239_v3  ;;  %v1198_v31 = vadd.f32 %v1197_v21, %v1196_v54 }
 0x473   : > { %v1281_v12 = vsel %vm629_vm2, %v1279_v49, 0.0  ;;  %v1278_v60 = vmul.f32 %v1276_v26, %v1164_v17  ;;  %1303 = vst.msk [vmem:[#allocation8] sm:$0xff] %vm629_vm2, %v1276_v26  ;;  %v1213_v33 = vadd.f32 %v1212_v8, %v1211_v62  ;;  %v1183_v1 = vadd.f32 %v1182_v13, %v1181_v20 }
 0x474   : > { %v1255_v45 = vrot.slane %v1254_v55, 2  ;;  %v1268_v9 = vrot.slane %v1267_v56, 4  ;;  %v1242_v0 = vrot.slane %v1241_v63, 1  ;;  %v1228_v34 = vadd.f32 %v1227_v29, %v1226_v25 }
 0x475   : > { %v1280_v15 = vsel %vm629_vm2, %v1278_v60, 0.0  ;;  %v1289_v38 = vsel %vm796_vm6, %v1183_v1, %v1198_v31  ;;  %v1313_v27 = vmul.f32 %v1582_v44, %v2099_v61  ;;  %v1323_v35 = vpop.permute.xlu1 %1322 }
 0x476   : > { %v1256_v24 = vadd.f32 %v1255_v45, %v1254_v55  ;;  %v1269_v23 = vadd.f32 %v1268_v9, %v1267_v56  ;;  %v1282_v58 = vadd.f32 %v1281_v12, %v1280_v15  ;;  %v1243_v37 = vadd.f32 %v1242_v0, %v1241_v63 }
 0x477   : > { %v1291_v10 = vsel %vm1290_vm9, %v1289_v38, %v1213_v33 }
 0x478   : > { %v1270_v30 = vrot.slane %v1269_v23, 2  ;;  %v1283_v39 = vrot.slane %v1282_v58, 4  ;;  %v1257_v59 = vrot.slane %v1256_v24, 1  ;;  %v1293_v18 = vsel %vm1292_vm10, %v1291_v10, %v1228_v34 }
 0x479   : > { %v1295_v22 = vsel %vm1294_vm11, %v1293_v18, %v1243_v37 }
 0x47a   : > { %v1271_v36 = vadd.f32 %v1270_v30, %v1269_v23  ;;  %v1284_v53 = vadd.f32 %v1283_v39, %v1282_v58  ;;  %v1258_v40 = vadd.f32 %v1257_v59, %v1256_v24 }
 0x47c   : > { %v1272_v32 = vrot.slane %v1271_v36, 1  ;;  %v1285_v48 = vrot.slane %v1284_v53, 2  ;;  %v1297_v4 = vsel %vm1296_vm12, %v1295_v22, %v1258_v40 }
 0x47e   : > { %v1286_v6 = vadd.f32 %v1285_v48, %v1284_v53  ;;  %v1273_v28 = vadd.f32 %v1272_v32, %v1271_v36 }
 0x480   : > { %v1287_v42 = vrot.slane %v1286_v6, 1  ;;  %v1299_v43 = vsel %vm1298_vm13, %v1297_v4, %v1273_v28 }
 0x482   : > { %v1288_v19 = vadd.f32 %v1287_v42, %v1286_v6 }
 0x484   : > { %v1301_v7 = vsel %vm1300_vm14, %v1299_v43, %v1288_v19 }
 0x485   : > { %1302 = vst.msk [vmem:[#allocation7] sm:$0xff] %vm629_vm2, %v1301_v7 }
 0x48c   : > { %v1305_v16 = vld [vmem:[#allocation7] sm:$0xff] }
 0x48d   : > { %v1314_v51 = vadd.f32 %v1313_v27, %v1305_v16 }
 0x48f   : > { %v1325_v3 = vmul.f32 %v1323_v35, %v1314_v51 }
 0x491   : > { %v1326_v47 = vpack.c.bf16 %v1325_v3, %v1325_v3 }
 0x493   : > { %1644 = vmatmul.mubr.msk.bf16.vlgmr.msra.gmra.mrb[4].mxu0 %vm629_vm2, %v1326_v47 }
 0x494   : > { %1781 = shalt.err (!%p1778_p5)
}
 0x495   : > { %s1782_s28 = scalar_lea.hbm %s2344_s24, 128  ;;  %s1786_s1 = scalar_lea.hbm %s2434_s14, 256 }
 0x496   : > { %p1783_p6 = scmp.ne.s32.totalorder %s2344_s24, %s1782_s28  ;;  %p1787_p10 = scmp.lt.u32.totalorder %s2344_s24, %s2434_s14 }
 0x497   : > { %p1788_p11 = scmp.lt.u32.totalorder %s1786_s1, %s1782_s28  ;;  %p1790_p13 = scmp.lt.u32.totalorder %s1782_s28, %s2344_s24 }
 0x498   : > { %p1784_p7 = pnand %p1783_p6, %p2002_p4 }
 0x499   : > { %p1789_p12 = por %p1788_p11, %p1787_p10 }
 0x49a   : > { %p1785_p9 = pneg %p1784_p7 }
 0x49b   : > { %p1791_p0 = por %p1790_p13, %p1789_p12 }
 0x49d   : > { %p1792_p1 = pnand %p1791_p0, %p1785_p9 }
 0x49f   : > { %1795 = shalt.err (!%p1792_p1)
}
 0x4a0   : > { %1648 = dma.vmem_to_hbm [thread:$0]  (%p2002_p4), %s1438_s29, 128, %s2344_s24, %s1409_s21  }
 0x4a1   : > { %s2451_s0 = sshll.u32 %s2331_s17, 3  ;;  %s2452_s20 = sshll.u32 %s1870_s16, 7 }
 0x4a2   : > { %s507_s22 = scalar_lea.vmem [#allocation9], %s2451_s0  ;;  %s2371_s1 = scalar_lea.hbm %s2433_s13, %s2452_s20 }
 0x4a3   : > { %s1423_s19 = sshll.u32 %s507_s22, 4  ;;  %s1404_s24 = scalar_lea.sflag [#allocation10], %s2331_s17  ;;  %s2373_s19 = int_to_ptr.vmem [resolvable:$true] %s1423_s19 }
 0x4a4   : > { %s1796_s29 = scalar_lea.vmem %s2373_s19, 128  ;;  %s1886_s16 = smov [#allocation9]  }
 0x4a5   : > { %p1797_p2 = scmp.ne.s32.totalorder %s2373_s19, %s1796_s29  ;;  %s1800_s21 = sshll.u32 %s1886_s16, 4  ;;  %s1801_s21 = int_to_ptr.vmem [resolvable:$false] %s1800_s21 }
 0x4a6   : > { %s1802_s28 = scalar_lea.vmem %s1801_s21, 256  ;;  %p1803_p6 = scmp.lt.s32.totalorder %s2373_s19, %s1801_s21 }
 0x4a7   : > { %p1798_p3 = pnand %p1797_p2, %p2002_p4  ;;  %p1804_p7 = scmp.lt.s32.totalorder %s1802_s28, %s1796_s29 }
 0x4a9   : > { %p1799_p5 = pneg %p1798_p3  ;;  %p1805_p9 = por %p1804_p7, %p1803_p6 }
 0x4ab   : > { %p1806_p10 = pnand %p1805_p9, %p1799_p5 }
 0x566   : > { %v1396_v2 = vpop.f32.mrb[4].mxu0 }
 0x567   : > { %1402 = vst.msk [vmem:[%s507_s22] sm:$0xff] %vm533_vm0, %v1396_v2  ;;  %v1645_v61 = vpop.f32.mrb[5].mxu0 }
 0x568   : > { %v1399_v11 = vpop.f32.mrb[6].mxu0 }
 0x569   : > { %1809 = shalt.err (!%p1806_p10)
}
 0x56a   : > { %s1810_s17 = scalar_lea.hbm %s2371_s1, 128  ;;  %s1814_s20 = scalar_lea.hbm %s2433_s13, 256 }
 0x56b   : > { %p1811_p11 = scmp.ne.s32.totalorder %s2371_s1, %s1810_s17  ;;  %p1815_p0 = scmp.lt.u32.totalorder %s2371_s1, %s2433_s13 }
 0x56c   : > { %p1816_p1 = scmp.lt.u32.totalorder %s1814_s20, %s1810_s17  ;;  %p1818_p3 = scmp.lt.u32.totalorder %s1810_s17, %s2371_s1 }
 0x56d   : > { %p1812_p12 = pnand %p1811_p11, %p2002_p4 }
 0x56e   : > { %p1817_p2 = por %p1816_p1, %p1815_p0 }
 0x56f   : > { %p1813_p13 = pneg %p1812_p12 }
 0x570   : > { %p1819_p5 = por %p1818_p3, %p1817_p2 }
 0x572   : > { %p1820_p6 = pnand %p1819_p5, %p1813_p13 }
 0x574   : > { %1823 = shalt.err (!%p1820_p6)
}
 0x575   : > { %1647 = dma.vmem_to_hbm [thread:$0]  (%p2002_p4), %s2373_s19, 128, %s2371_s1, %s1404_s24   ;;  %v1646_v49 = vpop.f32.mrb[7].mxu0 }
 0x576 PF: > { %s2453_s29 = sld [smem:[#allocation15_spill]]  ;;  %p1658_p7 = scmp.ge.s32.totalorder %s1878_s18, 2 }
 0x578   : > { %p1652_p9 = pnand %p1658_p7, %p2009_p8 }
 0x57c   : > { %s1449_s16 = sand.u32 1, %s2453_s29  }
 0x57d   : > { %s1450_s21 = scalar_lea.sflag [#allocation10], %s1449_s16 }
 0x57e   : > { %1849 = dma.done.wait (!%p1652_p9), %s1450_s21, 128  }
 0x57f   : > { %1851 = vsyncadd (!%p1652_p9), %s1450_s21, 4294967168  ;;  %s1459_s28 = scalar_lea.sflag [#allocation12], %s1449_s16 }
 0x580   : > { %1853 = dma.done.wait (!%p1652_p9), %s1459_s28, 128  }
 0x581   : > { %1855 = vsyncadd (!%p1652_p9), %s1459_s28, 4294967168  ;;  %s31_s18 = sadd.s32 1, %s1878_s18   ;;  %s2454_s16 = sld [smem:[#allocation16_spill]] }
 0x582   : > { %p28_p10 = scmp.ge.s32.totalorder %s31_s18, 4   ;;  %s2455_s17 = sld [smem:[#allocation17_spill]] }
 0x583   : > { %s2456_s29 = smov %s1862_s30  ;;  %s2457_s30 = smov %s1866_s15 }
 0x584   : > { %s2458_s15 = smov %s2015_s26  ;;  %30 = sbr.rel (!%p28_p10) target bundleno = 10 (0xa), region = 139 }
 0x58b   :  { %1464 = vsyncpa [#allocation10], 1 }
 0x58c   :  { %1466 = vsyncpa [#allocation10 + $0x1], 1 }
 0x58d   :  { %1467 = vsyncpa [#allocation12], 1 }
 0x58e   :  { %1469 = vsyncpa [#allocation12 + $0x1], 1 }

</bundles_post_ra>
